<compile_context>
chip_gen: v7x
topology: tpu7x:2x2x1
jax: 0.10.0
libtpu: 0.0.40
codegen_flags: <defaults>
</compile_context>

<pallas_src>
import functools

import jax
import jax.numpy as jnp
import numpy as np
from jax.experimental import pallas as pl
from jax.experimental.pallas import tpu as pltpu


def _pick_q_tile(len_q, max_tile):
    """Largest query tile <= max_tile that divides len_q and respects (8,128) tiling."""
    if len_q <= max_tile:
        return len_q
    start = max_tile - (max_tile % 8)
    for t in range(start, 7, -8):
        if len_q % t == 0:
            return t
    return len_q  # no suitable divisor: fall back to a single full-length tile


def _mha_kernel(*args, n_head, kv_shared, has_mask, return_attn, eps=1e-5):
    # ---- unpack refs: inputs, outputs, scratch --------------------------------
    i = 0
    q_ref = args[i]; i += 1
    if kv_shared:
        k_ref = v_ref = args[i]; i += 1
    else:
        k_ref, v_ref = args[i], args[i + 1]; i += 2
    mask_ref = None
    if has_mask:
        mask_ref = args[i]; i += 1
    (wq_ref, bq_ref, wk_ref, bk_ref, wv_ref, bv_ref,
     g_ref, beta_ref, wo_ref, bo_ref) = args[i:i + 10]; i += 10
    out_ref = args[i]; i += 1
    attn_ref = None
    if return_attn:
        attn_ref = args[i]; i += 1
    k_scr, v_scr = args[i], args[i + 1]

    d_model = q_ref.shape[-1]
    tq = q_ref.shape[1]
    len_k = k_ref.shape[1]
    bf16 = jnp.bfloat16

    gamma = g_ref[...]
    beta = beta_ref[...]

    def layer_norm(x):
        mu = jnp.mean(x, axis=-1, keepdims=True)
        var = jnp.mean(jnp.square(x - mu), axis=-1, keepdims=True)
        return (x - mu) * jax.lax.rsqrt(var + eps) * gamma + beta

    # ---- K/V path: LN + projection once per batch element (first q tile),
    # cached in VMEM scratch as bf16 and reused across query tiles. -------------
    @pl.when(pl.program_id(1) == 0)
    def _():
        kn = layer_norm(k_ref[0]).astype(bf16)
        kn3 = jnp.broadcast_to(kn[None], (n_head, len_k, d_model))
        if kv_shared:
            vn3 = kn3                                   # shared KV: single LN
        else:
            vn = layer_norm(v_ref[0]).astype(bf16)
            vn3 = jnp.broadcast_to(vn[None], (n_head, len_k, d_model))
        K = jnp.einsum('hsd,hdk->hsk', kn3, wk_ref[...],
                       preferred_element_type=jnp.float32) + bk_ref[...]
        V = jnp.einsum('hsd,hdv->hsv', vn3, wv_ref[...],
                       preferred_element_type=jnp.float32) + bv_ref[...]
        k_scr[...] = K.astype(bf16)
        v_scr[...] = V.astype(bf16)

    # ---- Q path for this query tile -------------------------------------------
    q = q_ref[0]                                        # (tq, d_model) f32 residual
    qn = layer_norm(q).astype(bf16)
    qn3 = jnp.broadcast_to(qn[None], (n_head, tq, d_model))
    # 1/sqrt(d_k) is folded into wq/bq by the wrapper.
    Q = jnp.einsum('hld,hdk->hlk', qn3, wq_ref[...],
                   preferred_element_type=jnp.float32) + bq_ref[...]

    # All-head scores in one batched bf16 matmul (head = batch dim).
    S = jnp.einsum('hlk,hsk->hls', Q.astype(bf16), k_scr[...],
                   preferred_element_type=jnp.float32)  # (h, tq, len_k)
    if has_mask:
        S = jnp.where(mask_ref[0][None] > 0.5, -jnp.inf, S)

    # Numerically-stable softmax over keys; reciprocal on the EUP slot.
    m = jnp.max(S, axis=-1, keepdims=True)
    e = jnp.exp(S - m)
    p = e * pl.reciprocal(jnp.sum(e, axis=-1, keepdims=True), approx=True)

    if return_attn:
        attn_ref[...] = p.reshape(attn_ref.shape)

    # Context + output projection (heads reduced directly into the projection —
    # no lane-dim concatenate).  Attention dropout / output dropout = identity.
    ctx = jnp.einsum('hls,hsv->hlv', p.astype(bf16), v_scr[...],
                     preferred_element_type=jnp.float32)
    outh = jnp.einsum('hlv,hvd->hld', ctx.astype(bf16), wo_ref[...],
                      preferred_element_type=jnp.float32)
    out = jnp.sum(outh, axis=0) + bo_ref[...] + q       # + residual (pre-LN q)
    out_ref[0] = out.astype(out_ref.dtype)


def multi_head_attention(q, k, v, params, *, n_head, d_k, d_v, mask=None,
                         return_attn=True, max_q_tile=256):
    sz_b, len_q, d_model = q.shape
    _, len_k, _ = k.shape

    wq, bq, wk, bk, wv, bv, gamma, beta, wo, bo = params
    scale = jnp.float32(d_k) ** 0.5

    # nn.Linear weights (out, in) -> per-head (n_head, d_model, d_head): heads
    # live on a leading axis so the kernel never slices the lane dimension.
    # Weights are pre-cast to bf16 (f32 accumulation on the MXU); the 1/sqrt(d_k)
    # attention scale is folded into the Q projection.
    wq3 = (wq.reshape(n_head, d_k, d_model).transpose(0, 2, 1) / scale).astype(jnp.bfloat16)
    wk3 = wk.reshape(n_head, d_k, d_model).transpose(0, 2, 1).astype(jnp.bfloat16)
    wv3 = wv.reshape(n_head, d_v, d_model).transpose(0, 2, 1).astype(jnp.bfloat16)
    wo3 = wo.T.reshape(n_head, d_v, d_model).astype(jnp.bfloat16)
    bq3 = (bq.reshape(n_head, 1, d_k) / scale).astype(jnp.float32)
    bk3 = bk.reshape(n_head, 1, d_k).astype(jnp.float32)
    bv3 = bv.reshape(n_head, 1, d_v).astype(jnp.float32)
    bo2 = bo.reshape(1, d_model).astype(jnp.float32)
    g2 = gamma.reshape(1, d_model).astype(jnp.float32)
    b2 = beta.reshape(1, d_model).astype(jnp.float32)

    kv_shared = k is v          # self-attention / shared KV: one DMA + one LN
    has_mask = mask is not None

    tq = _pick_q_tile(len_q, max_q_tile)
    grid = (sz_b, len_q // tq)

    inputs = [q]
    in_specs = [pl.BlockSpec((1, tq, d_model), lambda b, qi: (b, qi, 0))]
    kv_spec = pl.BlockSpec((1, len_k, d_model), lambda b, qi: (b, 0, 0))
    if kv_shared:
        inputs.append(k); in_specs.append(kv_spec)
    else:
        inputs += [k, v]; in_specs += [kv_spec, kv_spec]
    if has_mask:
        inputs.append(jnp.asarray(mask).astype(jnp.float32))   # 1.0 == masked
        in_specs.append(pl.BlockSpec((1, tq, len_k), lambda b, qi: (b, qi, 0)))

    weights = [wq3, bq3, wk3, bk3, wv3, bv3, g2, b2, wo3, bo2]
    inputs += weights
    in_specs += [pl.BlockSpec(w.shape, lambda b, qi, _n=w.ndim: (0,) * _n)
                 for w in weights]

    out_shape = [jax.ShapeDtypeStruct((sz_b, len_q, d_model), jnp.float32)]
    out_specs = [pl.BlockSpec((1, tq, d_model), lambda b, qi: (b, qi, 0))]
    if return_attn:
        # Head-major layout -> PyTorch's (n_head*sz_b, len_q, len_k) is a free
        # reshape (no extra HBM transpose over the largest output tensor).
        out_shape.append(jax.ShapeDtypeStruct((n_head, sz_b, len_q, len_k), jnp.float32))
        out_specs.append(pl.BlockSpec((n_head, 1, tq, len_k),
                                      lambda b, qi: (0, b, qi, 0)))

    kernel = functools.partial(_mha_kernel, n_head=n_head, kv_shared=kv_shared,
                               has_mask=has_mask, return_attn=return_attn)

    results = pl.pallas_call(
        kernel,
        out_shape=tuple(out_shape),
        grid=grid,
        in_specs=in_specs,
        out_specs=tuple(out_specs),
        scratch_shapes=[
            pltpu.VMEM((n_head, len_k, d_k), jnp.bfloat16),   # cached projected K
            pltpu.VMEM((n_head, len_k, d_v), jnp.bfloat16),   # cached projected V
        ],
        compiler_params=pltpu.CompilerParams(
            dimension_semantics=("parallel", "arbitrary"),
            vmem_limit_bytes=64 * 1024 * 1024),
    )(*inputs)

    if return_attn:
        out, attn = results
        return out, attn.reshape(n_head * sz_b, len_q, len_k)
    (out,) = results
    return out, None


# --------------------------- pure-JAX reference --------------------------------
def mha_reference(q, k, v, params, *, n_head, d_k, d_v, mask=None, eps=1e-5):
    wq, bq, wk, bk, wv, bv, gamma, beta, wo, bo = params
    sz_b, len_q, _ = q.shape
    len_k = k.shape[1]

    def ln(x):
        mu = jnp.mean(x, axis=-1, keepdims=True)
        var = jnp.mean(jnp.square(x - mu), axis=-1, keepdims=True)
        return (x - mu) / jnp.sqrt(var + eps) * gamma + beta

    residual = q
    Q = ln(q) @ wq.T + bq
    K = ln(k) @ wk.T + bk
    V = ln(v) @ wv.T + bv
    Q = Q.reshape(sz_b, len_q, n_head, d_k).transpose(2, 0, 1, 3).reshape(-1, len_q, d_k)
    K = K.reshape(sz_b, len_k, n_head, d_k).transpose(2, 0, 1, 3).reshape(-1, len_k, d_k)
    V = V.reshape(sz_b, len_k, n_head, d_v).transpose(2, 0, 1, 3).reshape(-1, len_k, d_v)
    attn = Q @ jnp.swapaxes(K, -1, -2) / (d_k ** 0.5)
    if mask is not None:
        attn = jnp.where(jnp.tile(mask, (n_head, 1, 1)), -jnp.inf, attn)
    attn = jax.nn.softmax(attn, axis=-1)
    out = attn @ V
    out = out.reshape(n_head, sz_b, len_q, d_v).transpose(1, 2, 0, 3).reshape(sz_b, len_q, -1)
    out = out @ wo.T + bo
    return out + residual, attn


def init_params(key, n_head, d_model, d_k, d_v):
    ks = jax.random.split(key, 8)
    std_qk = np.sqrt(2.0 / (d_model + d_k))
    std_v = np.sqrt(2.0 / (d_model + d_v))
    std_fc = np.sqrt(2.0 / (n_head * d_v + d_model))   # xavier_normal_
    wq = std_qk * jax.random.normal(ks[0], (n_head * d_k, d_model), jnp.float32)
    wk = std_qk * jax.random.normal(ks[1], (n_head * d_k, d_model), jnp.float32)
    wv = std_v * jax.random.normal(ks[2], (n_head * d_v, d_model), jnp.float32)
    wo = std_fc * jax.random.normal(ks[3], (d_model, n_head * d_v), jnp.float32)
    bq = 0.01 * jax.random.normal(ks[4], (n_head * d_k,), jnp.float32)
    bk = 0.01 * jax.random.normal(ks[5], (n_head * d_k,), jnp.float32)
    bv = 0.01 * jax.random.normal(ks[6], (n_head * d_v,), jnp.float32)
    bo = 0.01 * jax.random.normal(ks[7], (d_model,), jnp.float32)
    gamma = jnp.ones((d_model,), jnp.float32)
    beta = jnp.zeros((d_model,), jnp.float32)
    return (wq, bq, wk, bk, wv, bv, gamma, beta, wo, bo)


if __name__ == "__main__":
    n_head, d_model, d_k, d_v = 2, 32, 16, 16
    sz_b, seq = 2, 8

    key = jax.random.PRNGKey(0)
    kq, kk, kv_, kp = jax.random.split(key, 4)
    q = jax.random.normal(kq, (sz_b, seq, d_model), jnp.float32)
    k = jax.random.normal(kk, (sz_b, seq, d_model), jnp.float32)
    v = jax.random.normal(kv_, (sz_b, seq, d_model), jnp.float32)
    params = init_params(kp, n_head, d_model, d_k, d_v)

    # 1) cross-attention (distinct q/k/v), no mask.
    out, attn = multi_head_attention(q, k, v, params, n_head=n_head, d_k=d_k, d_v=d_v)
    jax.block_until_ready((out, attn))
    assert out.shape == (sz_b, seq, d_model)
    assert attn.shape == (n_head * sz_b, seq, seq)
    ref_out, ref_attn = mha_reference(q, k, v, params, n_head=n_head, d_k=d_k, d_v=d_v)
    np.testing.assert_allclose(np.asarray(out), np.asarray(ref_out), rtol=5e-2, atol=5e-2)
    np.testing.assert_allclose(np.asarray(attn), np.asarray(ref_attn), rtol=5e-2, atol=5e-2)

    # 2) self-attention (q is k is v): exercises the shared-KV single-LN path.
    out_s, attn_s = multi_head_attention(q, q, q, params, n_head=n_head, d_k=d_k, d_v=d_v)
    jax.block_until_ready((out_s, attn_s))
    ref_out_s, ref_attn_s = mha_reference(q, q, q, params, n_head=n_head, d_k=d_k, d_v=d_v)
    np.testing.assert_allclose(np.asarray(out_s), np.asarray(ref_out_s), rtol=5e-2, atol=5e-2)
    np.testing.assert_allclose(np.asarray(attn_s), np.asarray(ref_attn_s), rtol=5e-2, atol=5e-2)

    # 3) masked self-attention (pad the last two keys of each sequence).
    mask = jnp.zeros((sz_b, seq, seq), dtype=bool).at[:, :, -2:].set(True)
    out_m, attn_m = multi_head_attention(q, q, q, params, n_head=n_head, d_k=d_k,
                                         d_v=d_v, mask=mask)
    jax.block_until_ready((out_m, attn_m))
    ref_out_m, ref_attn_m = mha_reference(q, q, q, params, n_head=n_head, d_k=d_k,
                                          d_v=d_v, mask=mask)
    np.testing.assert_allclose(np.asarray(out_m), np.asarray(ref_out_m), rtol=5e-2, atol=5e-2)
    np.testing.assert_allclose(np.asarray(attn_m), np.asarray(ref_attn_m), rtol=5e-2, atol=5e-2)

    print("KERNEL_OK")
</pallas_src>

<mosaic_0001>
module attributes {stable_mosaic.version = 11 : i64} {
  func.func @_mha_kernel(%arg0: i32, %arg1: i32, %arg2: memref<1x8x32xf32, #tpu.memory_space<vmem>>, %arg3: memref<1x8x32xf32, #tpu.memory_space<vmem>>, %arg4: memref<1x8x32xf32, #tpu.memory_space<vmem>>, %arg5: memref<2x32x16xbf16, #tpu.memory_space<vmem>>, %arg6: memref<2x1x16xf32, #tpu.memory_space<vmem>>, %arg7: memref<2x32x16xbf16, #tpu.memory_space<vmem>>, %arg8: memref<2x1x16xf32, #tpu.memory_space<vmem>>, %arg9: memref<2x32x16xbf16, #tpu.memory_space<vmem>>, %arg10: memref<2x1x16xf32, #tpu.memory_space<vmem>>, %arg11: memref<1x32xf32, #tpu.memory_space<vmem>>, %arg12: memref<1x32xf32, #tpu.memory_space<vmem>>, %arg13: memref<2x16x32xbf16, #tpu.memory_space<vmem>>, %arg14: memref<1x32xf32, #tpu.memory_space<vmem>>, %arg15: memref<1x8x32xf32, #tpu.memory_space<vmem>>, %arg16: memref<2x1x8x8xf32, #tpu.memory_space<vmem>>, %arg17: memref<2x8x16xbf16, #tpu.memory_space<vmem>>, %arg18: memref<2x8x16xbf16, #tpu.memory_space<vmem>>) attributes {dimension_semantics = [#tpu.dimension_semantics<parallel>, #tpu.dimension_semantics<arbitrary>], iteration_bounds = array<i64: 2, 1>, scalar_prefetch = 0 : i64, scratch_operands = 2 : i64, tpu.core_type = #tpu.core_type<tc>, window_params = [{transform_indices = @transform_0, window_bounds = array<i64: 1, 8, 32>}, {transform_indices = @transform_1, window_bounds = array<i64: 1, 8, 32>}, {transform_indices = @transform_2, window_bounds = array<i64: 1, 8, 32>}, {pipeline_mode = #tpu.pipeline_mode<synchronous>, transform_indices = @transform_3, window_bounds = array<i64: 2, 32, 16>}, {pipeline_mode = #tpu.pipeline_mode<synchronous>, transform_indices = @transform_4, window_bounds = array<i64: 2, 1, 16>}, {pipeline_mode = #tpu.pipeline_mode<synchronous>, transform_indices = @transform_5, window_bounds = array<i64: 2, 32, 16>}, {pipeline_mode = #tpu.pipeline_mode<synchronous>, transform_indices = @transform_6, window_bounds = array<i64: 2, 1, 16>}, {pipeline_mode = #tpu.pipeline_mode<synchronous>, transform_indices = @transform_7, window_bounds = array<i64: 2, 32, 16>}, {pipeline_mode = #tpu.pipeline_mode<synchronous>, transform_indices = @transform_8, window_bounds = array<i64: 2, 1, 16>}, {pipeline_mode = #tpu.pipeline_mode<synchronous>, transform_indices = @transform_9, window_bounds = array<i64: 1, 32>}, {pipeline_mode = #tpu.pipeline_mode<synchronous>, transform_indices = @transform_10, window_bounds = array<i64: 1, 32>}, {pipeline_mode = #tpu.pipeline_mode<synchronous>, transform_indices = @transform_11, window_bounds = array<i64: 2, 16, 32>}, {pipeline_mode = #tpu.pipeline_mode<synchronous>, transform_indices = @transform_12, window_bounds = array<i64: 1, 32>}, {transform_indices = @transform_13, window_bounds = array<i64: 1, 8, 32>}, {transform_indices = @transform_14, window_bounds = array<i64: 2, 1, 8, 8>}]} {
    %c0 = arith.constant 0 : index
    %c0_0 = arith.constant 0 : index
    %0 = vector.load %arg11[%c0, %c0_0] : memref<1x32xf32, #tpu.memory_space<vmem>>, vector<1x32xf32>
    %c0_1 = arith.constant 0 : index
    %c0_2 = arith.constant 0 : index
    %1 = vector.load %arg12[%c0_1, %c0_2] : memref<1x32xf32, #tpu.memory_space<vmem>>, vector<1x32xf32>
    %c0_i32 = arith.constant 0 : i32
    %2 = arith.cmpi eq, %arg1, %c0_i32 : i32
    %3 = arith.extui %2 : i1 to i32
    %c0_i32_3 = arith.constant 0 : i32
    %4 = arith.cmpi ne, %3, %c0_i32_3 : i32
    scf.if %4 {
      %c0_42 = arith.constant 0 : index
      %c0_43 = arith.constant 0 : index
      %c0_44 = arith.constant 0 : index
      %67 = vector.load %arg3[%c0_42, %c0_43, %c0_44] : memref<1x8x32xf32, #tpu.memory_space<vmem>>, vector<1x8x32xf32>
      %68 = vector.shape_cast %67 : vector<1x8x32xf32> to vector<8x32xf32>
      %cst_45 = arith.constant dense<0.000000e+00> : vector<8xf32>
      %69 = vector.multi_reduction <add>, %68, %cst_45 [1] : vector<8x32xf32> to vector<8xf32>
      %70 = vector.shape_cast %69 : vector<8xf32> to vector<8x1xf32>
      %cst_46 = arith.constant 3.200000e+01 : f32
      %71 = vector.broadcast %cst_46 : f32 to vector<8x1xf32>
      %72 = arith.divf %70, %71 : vector<8x1xf32>
      %73 = vector.broadcast %72 : vector<8x1xf32> to vector<8x32xf32>
      %74 = arith.subf %68, %73 : vector<8x32xf32>
      %75 = arith.mulf %74, %74 : vector<8x32xf32>
      %cst_47 = arith.constant dense<0.000000e+00> : vector<8xf32>
      %76 = vector.multi_reduction <add>, %75, %cst_47 [1] : vector<8x32xf32> to vector<8xf32>
      %77 = vector.shape_cast %76 : vector<8xf32> to vector<8x1xf32>
      %cst_48 = arith.constant 3.200000e+01 : f32
      %78 = vector.broadcast %cst_48 : f32 to vector<8x1xf32>
      %79 = arith.divf %77, %78 : vector<8x1xf32>
      %80 = vector.broadcast %72 : vector<8x1xf32> to vector<8x32xf32>
      %81 = arith.subf %68, %80 : vector<8x32xf32>
      %cst_49 = arith.constant 9.99999974E-6 : f32
      %82 = vector.broadcast %cst_49 : f32 to vector<8x1xf32>
      %83 = arith.addf %79, %82 : vector<8x1xf32>
      %84 = math.rsqrt %83 : vector<8x1xf32>
      %85 = vector.broadcast %84 : vector<8x1xf32> to vector<8x32xf32>
      %86 = arith.mulf %81, %85 : vector<8x32xf32>
      %87 = vector.broadcast %0 : vector<1x32xf32> to vector<8x32xf32>
      %88 = arith.mulf %86, %87 : vector<8x32xf32>
      %89 = vector.broadcast %1 : vector<1x32xf32> to vector<8x32xf32>
      %90 = arith.addf %88, %89 : vector<8x32xf32>
      %91 = arith.truncf %90 : vector<8x32xf32> to vector<8x32xbf16>
      %92 = vector.shape_cast %91 : vector<8x32xbf16> to vector<1x8x32xbf16>
      %93 = vector.shape_cast %92 : vector<1x8x32xbf16> to vector<1x8x32xbf16>
      %94 = vector.broadcast %93 : vector<1x8x32xbf16> to vector<2x8x32xbf16>
      %c0_50 = arith.constant 0 : index
      %c0_51 = arith.constant 0 : index
      %c0_52 = arith.constant 0 : index
      %95 = vector.load %arg4[%c0_50, %c0_51, %c0_52] : memref<1x8x32xf32, #tpu.memory_space<vmem>>, vector<1x8x32xf32>
      %96 = vector.shape_cast %95 : vector<1x8x32xf32> to vector<8x32xf32>
      %cst_53 = arith.constant dense<0.000000e+00> : vector<8xf32>
      %97 = vector.multi_reduction <add>, %96, %cst_53 [1] : vector<8x32xf32> to vector<8xf32>
      %98 = vector.shape_cast %97 : vector<8xf32> to vector<8x1xf32>
      %cst_54 = arith.constant 3.200000e+01 : f32
      %99 = vector.broadcast %cst_54 : f32 to vector<8x1xf32>
      %100 = arith.divf %98, %99 : vector<8x1xf32>
      %101 = vector.broadcast %100 : vector<8x1xf32> to vector<8x32xf32>
      %102 = arith.subf %96, %101 : vector<8x32xf32>
      %103 = arith.mulf %102, %102 : vector<8x32xf32>
      %cst_55 = arith.constant dense<0.000000e+00> : vector<8xf32>
      %104 = vector.multi_reduction <add>, %103, %cst_55 [1] : vector<8x32xf32> to vector<8xf32>
      %105 = vector.shape_cast %104 : vector<8xf32> to vector<8x1xf32>
      %cst_56 = arith.constant 3.200000e+01 : f32
      %106 = vector.broadcast %cst_56 : f32 to vector<8x1xf32>
      %107 = arith.divf %105, %106 : vector<8x1xf32>
      %108 = vector.broadcast %100 : vector<8x1xf32> to vector<8x32xf32>
      %109 = arith.subf %96, %108 : vector<8x32xf32>
      %cst_57 = arith.constant 9.99999974E-6 : f32
      %110 = vector.broadcast %cst_57 : f32 to vector<8x1xf32>
      %111 = arith.addf %107, %110 : vector<8x1xf32>
      %112 = math.rsqrt %111 : vector<8x1xf32>
      %113 = vector.broadcast %112 : vector<8x1xf32> to vector<8x32xf32>
      %114 = arith.mulf %109, %113 : vector<8x32xf32>
      %115 = vector.broadcast %0 : vector<1x32xf32> to vector<8x32xf32>
      %116 = arith.mulf %114, %115 : vector<8x32xf32>
      %117 = vector.broadcast %1 : vector<1x32xf32> to vector<8x32xf32>
      %118 = arith.addf %116, %117 : vector<8x32xf32>
      %119 = arith.truncf %118 : vector<8x32xf32> to vector<8x32xbf16>
      %120 = vector.shape_cast %119 : vector<8x32xbf16> to vector<1x8x32xbf16>
      %121 = vector.shape_cast %120 : vector<1x8x32xbf16> to vector<1x8x32xbf16>
      %122 = vector.broadcast %121 : vector<1x8x32xbf16> to vector<2x8x32xbf16>
      %c0_58 = arith.constant 0 : index
      %c0_59 = arith.constant 0 : index
      %c0_60 = arith.constant 0 : index
      %123 = vector.load %arg7[%c0_58, %c0_59, %c0_60] : memref<2x32x16xbf16, #tpu.memory_space<vmem>>, vector<2x32x16xbf16>
      "tpu.trace_start"() <{level = 10 : i32, message = "hsd,hdk->hsk"}> : () -> ()
      %cst_61 = arith.constant dense<0.000000e+00> : vector<2x8x16xf32>
      %124 = tpu.matmul %94, %123, %cst_61 {dimension_numbers = #tpu.dot_dimension_numbers<[2], [1], [1], [2], [0, 0, 0, 1, 1, 2], [0], [0]>} : vector<2x8x32xbf16>, vector<2x32x16xbf16>, vector<2x8x16xf32> -> vector<2x8x16xf32>
      "tpu.trace_stop"() : () -> ()
      %c0_62 = arith.constant 0 : index
      %c0_63 = arith.constant 0 : index
      %c0_64 = arith.constant 0 : index
      %125 = vector.load %arg8[%c0_62, %c0_63, %c0_64] : memref<2x1x16xf32, #tpu.memory_space<vmem>>, vector<2x1x16xf32>
      %126 = vector.broadcast %125 : vector<2x1x16xf32> to vector<2x8x16xf32>
      %127 = arith.addf %124, %126 : vector<2x8x16xf32>
      %c0_65 = arith.constant 0 : index
      %c0_66 = arith.constant 0 : index
      %c0_67 = arith.constant 0 : index
      %128 = vector.load %arg9[%c0_65, %c0_66, %c0_67] : memref<2x32x16xbf16, #tpu.memory_space<vmem>>, vector<2x32x16xbf16>
      "tpu.trace_start"() <{level = 10 : i32, message = "hsd,hdv->hsv"}> : () -> ()
      %cst_68 = arith.constant dense<0.000000e+00> : vector<2x8x16xf32>
      %129 = tpu.matmul %122, %128, %cst_68 {dimension_numbers = #tpu.dot_dimension_numbers<[2], [1], [1], [2], [0, 0, 0, 1, 1, 2], [0], [0]>} : vector<2x8x32xbf16>, vector<2x32x16xbf16>, vector<2x8x16xf32> -> vector<2x8x16xf32>
      "tpu.trace_stop"() : () -> ()
      %c0_69 = arith.constant 0 : index
      %c0_70 = arith.constant 0 : index
      %c0_71 = arith.constant 0 : index
      %130 = vector.load %arg10[%c0_69, %c0_70, %c0_71] : memref<2x1x16xf32, #tpu.memory_space<vmem>>, vector<2x1x16xf32>
      %131 = vector.broadcast %130 : vector<2x1x16xf32> to vector<2x8x16xf32>
      %132 = arith.addf %129, %131 : vector<2x8x16xf32>
      %133 = arith.truncf %127 : vector<2x8x16xf32> to vector<2x8x16xbf16>
      %c0_72 = arith.constant 0 : index
      %c0_73 = arith.constant 0 : index
      %c0_74 = arith.constant 0 : index
      %134 = vector.load %arg17[%c0_72, %c0_73, %c0_74] : memref<2x8x16xbf16, #tpu.memory_space<vmem>>, vector<2x8x16xbf16>
      tpu.vector_store %arg17[%c0_72, %c0_73, %c0_74], %133 {strides = array<i32>} : memref<2x8x16xbf16, #tpu.memory_space<vmem>>, vector<2x8x16xbf16>,
      %135 = arith.truncf %132 : vector<2x8x16xf32> to vector<2x8x16xbf16>
      %c0_75 = arith.constant 0 : index
      %c0_76 = arith.constant 0 : index
      %c0_77 = arith.constant 0 : index
      %136 = vector.load %arg18[%c0_75, %c0_76, %c0_77] : memref<2x8x16xbf16, #tpu.memory_space<vmem>>, vector<2x8x16xbf16>
      tpu.vector_store %arg18[%c0_75, %c0_76, %c0_77], %135 {strides = array<i32>} : memref<2x8x16xbf16, #tpu.memory_space<vmem>>, vector<2x8x16xbf16>,
    } else {
    }
    %c0_4 = arith.constant 0 : index
    %c0_5 = arith.constant 0 : index
    %c0_6 = arith.constant 0 : index
    %5 = vector.load %arg2[%c0_4, %c0_5, %c0_6] : memref<1x8x32xf32, #tpu.memory_space<vmem>>, vector<1x8x32xf32>
    %6 = vector.shape_cast %5 : vector<1x8x32xf32> to vector<8x32xf32>
    %cst = arith.constant dense<0.000000e+00> : vector<8xf32>
    %7 = vector.multi_reduction <add>, %6, %cst [1] : vector<8x32xf32> to vector<8xf32>
    %8 = vector.shape_cast %7 : vector<8xf32> to vector<8x1xf32>
    %cst_7 = arith.constant 3.200000e+01 : f32
    %9 = vector.broadcast %cst_7 : f32 to vector<8x1xf32>
    %10 = arith.divf %8, %9 : vector<8x1xf32>
    %11 = vector.broadcast %10 : vector<8x1xf32> to vector<8x32xf32>
    %12 = arith.subf %6, %11 : vector<8x32xf32>
    %13 = arith.mulf %12, %12 : vector<8x32xf32>
    %cst_8 = arith.constant dense<0.000000e+00> : vector<8xf32>
    %14 = vector.multi_reduction <add>, %13, %cst_8 [1] : vector<8x32xf32> to vector<8xf32>
    %15 = vector.shape_cast %14 : vector<8xf32> to vector<8x1xf32>
    %cst_9 = arith.constant 3.200000e+01 : f32
    %16 = vector.broadcast %cst_9 : f32 to vector<8x1xf32>
    %17 = arith.divf %15, %16 : vector<8x1xf32>
    %18 = vector.broadcast %10 : vector<8x1xf32> to vector<8x32xf32>
    %19 = arith.subf %6, %18 : vector<8x32xf32>
    %cst_10 = arith.constant 9.99999974E-6 : f32
    %20 = vector.broadcast %cst_10 : f32 to vector<8x1xf32>
    %21 = arith.addf %17, %20 : vector<8x1xf32>
    %22 = math.rsqrt %21 : vector<8x1xf32>
    %23 = vector.broadcast %22 : vector<8x1xf32> to vector<8x32xf32>
    %24 = arith.mulf %19, %23 : vector<8x32xf32>
    %25 = vector.broadcast %0 : vector<1x32xf32> to vector<8x32xf32>
    %26 = arith.mulf %24, %25 : vector<8x32xf32>
    %27 = vector.broadcast %1 : vector<1x32xf32> to vector<8x32xf32>
    %28 = arith.addf %26, %27 : vector<8x32xf32>
    %29 = arith.truncf %28 : vector<8x32xf32> to vector<8x32xbf16>
    %30 = vector.shape_cast %29 : vector<8x32xbf16> to vector<1x8x32xbf16>
    %31 = vector.shape_cast %30 : vector<1x8x32xbf16> to vector<1x8x32xbf16>
    %32 = vector.broadcast %31 : vector<1x8x32xbf16> to vector<2x8x32xbf16>
    %c0_11 = arith.constant 0 : index
    %c0_12 = arith.constant 0 : index
    %c0_13 = arith.constant 0 : index
    %33 = vector.load %arg5[%c0_11, %c0_12, %c0_13] : memref<2x32x16xbf16, #tpu.memory_space<vmem>>, vector<2x32x16xbf16>
    "tpu.trace_start"() <{level = 10 : i32, message = "hld,hdk->hlk"}> : () -> ()
    %cst_14 = arith.constant dense<0.000000e+00> : vector<2x8x16xf32>
    %34 = tpu.matmul %32, %33, %cst_14 {dimension_numbers = #tpu.dot_dimension_numbers<[2], [1], [1], [2], [0, 0, 0, 1, 1, 2], [0], [0]>} : vector<2x8x32xbf16>, vector<2x32x16xbf16>, vector<2x8x16xf32> -> vector<2x8x16xf32>
    "tpu.trace_stop"() : () -> ()
    %c0_15 = arith.constant 0 : index
    %c0_16 = arith.constant 0 : index
    %c0_17 = arith.constant 0 : index
    %35 = vector.load %arg6[%c0_15, %c0_16, %c0_17] : memref<2x1x16xf32, #tpu.memory_space<vmem>>, vector<2x1x16xf32>
    %36 = vector.broadcast %35 : vector<2x1x16xf32> to vector<2x8x16xf32>
    %37 = arith.addf %34, %36 : vector<2x8x16xf32>
    %38 = arith.truncf %37 : vector<2x8x16xf32> to vector<2x8x16xbf16>
    %c0_18 = arith.constant 0 : index
    %c0_19 = arith.constant 0 : index
    %c0_20 = arith.constant 0 : index
    %39 = vector.load %arg17[%c0_18, %c0_19, %c0_20] : memref<2x8x16xbf16, #tpu.memory_space<vmem>>, vector<2x8x16xbf16>
    "tpu.trace_start"() <{level = 10 : i32, message = "hlk,hsk->hls"}> : () -> ()
    %cst_21 = arith.constant dense<0.000000e+00> : vector<2x8x8xf32>
    %40 = tpu.matmul %38, %39, %cst_21 {dimension_numbers = #tpu.dot_dimension_numbers<[2], [2], [1], [1], [0, 0, 0, 1, 1, 1], [0], [0]>} : vector<2x8x16xbf16>, vector<2x8x16xbf16>, vector<2x8x8xf32> -> vector<2x8x8xf32>
    "tpu.trace_stop"() : () -> ()
    %cst_22 = arith.constant dense<0xFF800000> : vector<2x8xf32>
    %41 = vector.multi_reduction <maximumf>, %40, %cst_22 [2] : vector<2x8x8xf32> to vector<2x8xf32>
    %42 = vector.shape_cast %41 : vector<2x8xf32> to vector<2x8x1xf32>
    %43 = vector.broadcast %42 : vector<2x8x1xf32> to vector<2x8x8xf32>
    %44 = arith.subf %40, %43 : vector<2x8x8xf32>
    %45 = math.exp %44 : vector<2x8x8xf32>
    %cst_23 = arith.constant dense<0.000000e+00> : vector<2x8xf32>
    %46 = vector.multi_reduction <add>, %45, %cst_23 [2] : vector<2x8x8xf32> to vector<2x8xf32>
    %47 = vector.shape_cast %46 : vector<2x8xf32> to vector<2x8x1xf32>
    %48 = tpu.reciprocal %47 {approx = true} : vector<2x8x1xf32> -> vector<2x8x1xf32>
    %49 = vector.broadcast %48 : vector<2x8x1xf32> to vector<2x8x8xf32>
    %50 = arith.mulf %45, %49 : vector<2x8x8xf32>
    %51 = vector.shape_cast %50 : vector<2x8x8xf32> to vector<2x1x8x8xf32>
    %c0_24 = arith.constant 0 : index
    %c0_25 = arith.constant 0 : index
    %c0_26 = arith.constant 0 : index
    %c0_27 = arith.constant 0 : index
    %52 = vector.load %arg16[%c0_24, %c0_25, %c0_26, %c0_27] : memref<2x1x8x8xf32, #tpu.memory_space<vmem>>, vector<2x1x8x8xf32>
    tpu.vector_store %arg16[%c0_24, %c0_25, %c0_26, %c0_27], %51 {strides = array<i32>} : memref<2x1x8x8xf32, #tpu.memory_space<vmem>>, vector<2x1x8x8xf32>,
    %53 = arith.truncf %50 : vector<2x8x8xf32> to vector<2x8x8xbf16>
    %c0_28 = arith.constant 0 : index
    %c0_29 = arith.constant 0 : index
    %c0_30 = arith.constant 0 : index
    %54 = vector.load %arg18[%c0_28, %c0_29, %c0_30] : memref<2x8x16xbf16, #tpu.memory_space<vmem>>, vector<2x8x16xbf16>
    "tpu.trace_start"() <{level = 10 : i32, message = "hls,hsv->hlv"}> : () -> ()
    %cst_31 = arith.constant dense<0.000000e+00> : vector<2x8x16xf32>
    %55 = tpu.matmul %53, %54, %cst_31 {dimension_numbers = #tpu.dot_dimension_numbers<[2], [1], [1], [2], [0, 0, 0, 1, 1, 2], [0], [0]>} : vector<2x8x8xbf16>, vector<2x8x16xbf16>, vector<2x8x16xf32> -> vector<2x8x16xf32>
    "tpu.trace_stop"() : () -> ()
    %56 = arith.truncf %55 : vector<2x8x16xf32> to vector<2x8x16xbf16>
    %c0_32 = arith.constant 0 : index
    %c0_33 = arith.constant 0 : index
    %c0_34 = arith.constant 0 : index
    %57 = vector.load %arg13[%c0_32, %c0_33, %c0_34] : memref<2x16x32xbf16, #tpu.memory_space<vmem>>, vector<2x16x32xbf16>
    "tpu.trace_start"() <{level = 10 : i32, message = "hlv,hvd->hld"}> : () -> ()
    %cst_35 = arith.constant dense<0.000000e+00> : vector<2x8x32xf32>
    %58 = tpu.matmul %56, %57, %cst_35 {dimension_numbers = #tpu.dot_dimension_numbers<[2], [1], [1], [2], [0, 0, 0, 1, 1, 2], [0], [0]>} : vector<2x8x16xbf16>, vector<2x16x32xbf16>, vector<2x8x32xf32> -> vector<2x8x32xf32>
    "tpu.trace_stop"() : () -> ()
    %cst_36 = arith.constant dense<0.000000e+00> : vector<8x32xf32>
    %59 = vector.multi_reduction <add>, %58, %cst_36 [0] : vector<2x8x32xf32> to vector<8x32xf32>
    %c0_37 = arith.constant 0 : index
    %c0_38 = arith.constant 0 : index
    %60 = vector.load %arg14[%c0_37, %c0_38] : memref<1x32xf32, #tpu.memory_space<vmem>>, vector<1x32xf32>
    %61 = vector.broadcast %60 : vector<1x32xf32> to vector<8x32xf32>
    %62 = arith.addf %59, %61 : vector<8x32xf32>
    %63 = arith.addf %62, %6 : vector<8x32xf32>
    %c0_39 = arith.constant 0 : index
    %c0_40 = arith.constant 0 : index
    %c0_41 = arith.constant 0 : index
    %64 = vector.load %arg15[%c0_39, %c0_40, %c0_41] : memref<1x8x32xf32, #tpu.memory_space<vmem>>, vector<1x8x32xf32>
    %65 = vector.shape_cast %64 : vector<1x8x32xf32> to vector<8x32xf32>
    %66 = vector.shape_cast %63 : vector<8x32xf32> to vector<1x8x32xf32>
    tpu.vector_store %arg15[%c0_39, %c0_40, %c0_41], %66 {strides = array<i32>} : memref<1x8x32xf32, #tpu.memory_space<vmem>>, vector<1x8x32xf32>,
    return
  }
  func.func @transform_0(%arg0: i32, %arg1: i32) -> (i32, i32, i32) {
    %c0_i32 = arith.constant 0 : i32
    %c0_i32_0 = arith.constant 0 : i32
    return %arg0, %arg1, %c0_i32 : i32, i32, i32
  }
  func.func @transform_1(%arg0: i32, %arg1: i32) -> (i32, i32, i32) {
    %c0_i32 = arith.constant 0 : i32
    %c0_i32_0 = arith.constant 0 : i32
    %c0_i32_1 = arith.constant 0 : i32
    return %arg0, %c0_i32, %c0_i32_0 : i32, i32, i32
  }
  func.func @transform_2(%arg0: i32, %arg1: i32) -> (i32, i32, i32) {
    %c0_i32 = arith.constant 0 : i32
    %c0_i32_0 = arith.constant 0 : i32
    %c0_i32_1 = arith.constant 0 : i32
    return %arg0, %c0_i32, %c0_i32_0 : i32, i32, i32
  }
  func.func @transform_3(%arg0: i32, %arg1: i32) -> (i32, i32, i32) {
    %c0_i32 = arith.constant 0 : i32
    %c0_i32_0 = arith.constant 0 : i32
    %c0_i32_1 = arith.constant 0 : i32
    %c0_i32_2 = arith.constant 0 : i32
    return %c0_i32, %c0_i32_0, %c0_i32_1 : i32, i32, i32
  }
  func.func @transform_4(%arg0: i32, %arg1: i32) -> (i32, i32, i32) {
    %c0_i32 = arith.constant 0 : i32
    %c0_i32_0 = arith.constant 0 : i32
    %c0_i32_1 = arith.constant 0 : i32
    %c0_i32_2 = arith.constant 0 : i32
    return %c0_i32, %c0_i32_0, %c0_i32_1 : i32, i32, i32
  }
  func.func @transform_5(%arg0: i32, %arg1: i32) -> (i32, i32, i32) {
    %c0_i32 = arith.constant 0 : i32
    %c0_i32_0 = arith.constant 0 : i32
    %c0_i32_1 = arith.constant 0 : i32
    %c0_i32_2 = arith.constant 0 : i32
    return %c0_i32, %c0_i32_0, %c0_i32_1 : i32, i32, i32
  }
  func.func @transform_6(%arg0: i32, %arg1: i32) -> (i32, i32, i32) {
    %c0_i32 = arith.constant 0 : i32
    %c0_i32_0 = arith.constant 0 : i32
    %c0_i32_1 = arith.constant 0 : i32
    %c0_i32_2 = arith.constant 0 : i32
    return %c0_i32, %c0_i32_0, %c0_i32_1 : i32, i32, i32
  }
  func.func @transform_7(%arg0: i32, %arg1: i32) -> (i32, i32, i32) {
    %c0_i32 = arith.constant 0 : i32
    %c0_i32_0 = arith.constant 0 : i32
    %c0_i32_1 = arith.constant 0 : i32
    %c0_i32_2 = arith.constant 0 : i32
    return %c0_i32, %c0_i32_0, %c0_i32_1 : i32, i32, i32
  }
  func.func @transform_8(%arg0: i32, %arg1: i32) -> (i32, i32, i32) {
    %c0_i32 = arith.constant 0 : i32
    %c0_i32_0 = arith.constant 0 : i32
    %c0_i32_1 = arith.constant 0 : i32
    %c0_i32_2 = arith.constant 0 : i32
    return %c0_i32, %c0_i32_0, %c0_i32_1 : i32, i32, i32
  }
  func.func @transform_9(%arg0: i32, %arg1: i32) -> (i32, i32) {
    %c0_i32 = arith.constant 0 : i32
    %c0_i32_0 = arith.constant 0 : i32
    %c0_i32_1 = arith.constant 0 : i32
    return %c0_i32, %c0_i32_0 : i32, i32
  }
  func.func @transform_10(%arg0: i32, %arg1: i32) -> (i32, i32) {
    %c0_i32 = arith.constant 0 : i32
    %c0_i32_0 = arith.constant 0 : i32
    %c0_i32_1 = arith.constant 0 : i32
    return %c0_i32, %c0_i32_0 : i32, i32
  }
  func.func @transform_11(%arg0: i32, %arg1: i32) -> (i32, i32, i32) {
    %c0_i32 = arith.constant 0 : i32
    %c0_i32_0 = arith.constant 0 : i32
    %c0_i32_1 = arith.constant 0 : i32
    %c0_i32_2 = arith.constant 0 : i32
    return %c0_i32, %c0_i32_0, %c0_i32_1 : i32, i32, i32
  }
  func.func @transform_12(%arg0: i32, %arg1: i32) -> (i32, i32) {
    %c0_i32 = arith.constant 0 : i32
    %c0_i32_0 = arith.constant 0 : i32
    %c0_i32_1 = arith.constant 0 : i32
    return %c0_i32, %c0_i32_0 : i32, i32
  }
  func.func @transform_13(%arg0: i32, %arg1: i32) -> (i32, i32, i32) {
    %c0_i32 = arith.constant 0 : i32
    %c0_i32_0 = arith.constant 0 : i32
    return %arg0, %arg1, %c0_i32 : i32, i32, i32
  }
  func.func @transform_14(%arg0: i32, %arg1: i32) -> (i32, i32, i32, i32) {
    %c0_i32 = arith.constant 0 : i32
    %c0_i32_0 = arith.constant 0 : i32
    %c0_i32_1 = arith.constant 0 : i32
    return %c0_i32, %arg0, %arg1, %c0_i32_0 : i32, i32, i32, i32
  }
}

</mosaic_0001>

<bundles_post_ra>
// kernel: tpu_custom_call.1
= control target key start
LH: loop header
LB: loop body
LE: loop exit
PB: predicated region body
PF: predicated region fallthrough
CT: control target
= control target key end

     0   :  { %s3476_s0 = inlined_call_operand.hbm [shape: f32[2,8,32], index: 0, kind: input, shape index: {}]   ;;  %s3477_s1 = inlined_call_operand.hbm [shape: f32[2,8,32], index: 1, kind: input, shape index: {}]   ;;  %s3478_s2 = inlined_call_operand.hbm [shape: f32[2,8,32], index: 2, kind: input, shape index: {}]   ;;  %s3479_s3 = inlined_call_operand.hbm [shape: bf16[2,32,16], index: 3, kind: input, shape index: {}]   ;;  %s3480_s4 = inlined_call_operand.hbm [shape: f32[2,1,16], index: 4, kind: input, shape index: {}]   ;;  %s3481_s5 = inlined_call_operand.hbm [shape: bf16[2,32,16], index: 5, kind: input, shape index: {}]   ;;  %s3482_s6 = inlined_call_operand.hbm [shape: f32[2,1,16], index: 6, kind: input, shape index: {}]   ;;  %s3483_s7 = inlined_call_operand.hbm [shape: bf16[2,32,16], index: 7, kind: input, shape index: {}]   ;;  %s3484_s8 = inlined_call_operand.hbm [shape: f32[2,1,16], index: 8, kind: input, shape index: {}]   ;;  %s3485_s9 = inlined_call_operand.hbm [shape: f32[1,32], index: 9, kind: input, shape index: {}]   ;;  %s3486_s10 = inlined_call_operand.hbm [shape: f32[1,32], index: 10, kind: input, shape index: {}]   ;;  %s3487_s11 = inlined_call_operand.hbm [shape: bf16[2,16,32], index: 11, kind: input, shape index: {}]   ;;  %s3488_s12 = inlined_call_operand.hbm [shape: f32[1,32], index: 12, kind: input, shape index: {}]   ;;  %s3489_s13 = inlined_call_operand.hbm [shape: f32[2,8,32], index: 13, kind: output, shape index: {0}]   ;;  %s3490_s14 = inlined_call_operand.hbm [shape: f32[2,2,8,8], index: 14, kind: output, shape index: {1}]  }
   0x1   :  { %3518 = sst [smem:[#allocation45_spill]] %s3476_s0 }
   0x2   :  { %3519 = sst [smem:[#allocation46_spill]] %s3477_s1 }
   0x3   :  { %3520 = sst [smem:[#allocation47_spill]] %s3478_s2 }
   0x4   :  { %3521 = sst [smem:[#allocation48_spill]] %s3479_s3 }
   0x5   :  { %3522 = sst [smem:[#allocation49_spill]] %s3481_s5 }
   0x6   :  { %3523 = sst [smem:[#allocation50_spill]] %s3483_s7 }
   0x7   :  { %3524 = sst [smem:[#allocation51_spill]] %s3485_s9 }
   0x8   :  { %3525 = sst [smem:[#allocation52_spill]] %s3486_s10 }
   0x9   :  { %3526 = sst [smem:[#allocation53_spill]] %s3487_s11 }
   0xa   :  { %3527 = sst [smem:[#allocation54_spill]] %s3488_s12 }
   0xb   :  { %3528 = sst [smem:[#allocation55_spill]] %s3489_s13 }
   0xc   :  { %3529 = sst [smem:[#allocation56_spill]] %s3490_s14 }
   0xd   :  { %20 = vsyncpa [#allocation5], 0 }
   0xe   :  { %22 = vsyncpa [#allocation5 + $0x1], 0 }
   0xf   :  { %23 = vsyncpa [#allocation8], 0 }
  0x10   :  { %25 = vsyncpa [#allocation8 + $0x1], 0 }
  0x11   :  { %26 = vsyncpa [#allocation11], 0 }
  0x12   :  { %27 = vsyncpa [#allocation14], 0 }
  0x13   :  { %28 = vsyncpa [#allocation17], 0 }
  0x14   :  { %29 = vsyncpa [#allocation20], 0 }
  0x15   :  { %30 = vsyncpa [#allocation23], 0 }
  0x16   :  { %31 = vsyncpa [#allocation6], 0 }
  0x17   :  { %33 = vsyncpa [#allocation6 + $0x1], 0 }
  0x18   :  { %34 = vsyncpa [#allocation27], 0 }
  0x19   :  { %36 = vsyncpa [#allocation27 + $0x1], 0  ;;  %s2843_s29 = smov 0   ;;  %s2845_s30 = smov 0  }
  0x1a   :  { %s2847_s15 = smov 0   ;;  %s2849_s16 = smov 0  }
  0x1b   :  { %s2851_s17 = smov 0   ;;  %s2853_s18 = smov 0  }
  0x1c LB: > { %3530 = sst [smem:[#allocation37_spill]] %s2722_s29  ;;  %s2874_s19 = sadd.s32 4294967295, %s2742_s18   ;;  %s2742_s18 = sphi %s2853_s18, %s42_s18   ;;  %s2738_s17 = sphi %s2851_s17, %s3588_s17   ;;  %s2734_s16 = sphi %s2849_s16, %s3587_s16   ;;  %s2730_s15 = sphi %s2847_s15, %s3591_s15   ;;  %s2726_s30 = sphi %s2845_s30, %s3590_s30   ;;  %s2722_s29 = sphi %s2843_s29, %s3589_s29  }
  0x1d   : > { %3531 = sst [smem:[#allocation38_spill]] %s2734_s16  ;;  %p1830_p0 = scmp.ge.s32.totalorder %s2742_s18, 1 }
  0x1e   : > { %3532 = sst [smem:[#allocation39_spill]] %s2738_s17  ;;  %p3499_p1 = scmp.eq.s32.totalorder %s2874_s19, 0 }
  0x1f   : > { %3533 = sst [smem:[#allocation40_spill]] %s2742_s18  ;;  %p405_p2 = scmp.lt.s32.totalorder %s2742_s18, 3 }
  0x20   : > { %s2744_s21 = smov [#allocation10]   ;;  %s2745_s24 = smov [#allocation13]  }
  0x21   : > { %p2879_p3 = pnand %p1830_p0, %p405_p2  ;;  %s417_s22 = sshll.u32 %s2744_s21, 4  ;;  %s2883_s22 = int_to_ptr.vmem [resolvable:$true] %s417_s22 }
  0x22   : > { %s443_s25 = sshll.u32 %s2745_s24, 4  ;;  %s2746_s26 = smov [#allocation16]   ;;  %s2894_s25 = int_to_ptr.vmem [resolvable:$true] %s443_s25 }
  0x23   : > { %s3534_s20 = scalar_select %p2879_p3, 1, 0 }
  0x24   : > { %p2069_p4 = pneg %p2879_p3  ;;  %s2896_s27 = sshll.u32 %s2746_s26, 4  ;;  %s470_s27 = int_to_ptr.vmem [resolvable:$true] %s2896_s27 }
  0x25   : > { %3535 = sst [smem:[#allocation41_spill]] %s3534_s20  ;;  %s3537_s3 = sld [smem:[#allocation48_spill]] }
  0x26   : > { %p2890_p6 = pnand %p2069_p4, %p3499_p1 }
  0x28   : > { %s3536_s23 = scalar_select %p2890_p6, 1, 0 }
  0x29   : > { %p2906_p8 = pneg %p2890_p6 }
  0x2b   : > { %s2234_s13 = scalar_lea.hbm %s3537_s3, 512 }
  0x2c   : > { %p2235_p7 = scmp.ne.s32.totalorder %s3537_s3, %s2234_s13  ;;  %p2241_p11 = scmp.lt.u32.totalorder %s2234_s13, %s3537_s3 }
  0x2d   : > { %s3538_s20 = scalar_select %p2906_p8, 1, 0 }
  0x2e   : > { %p2237_p9 = pnand %p2906_p8, %p2235_p7 }
  0x30   : > { %p2238_p10 = pneg %p2237_p9 }
  0x32   : > { %p2243_p12 = pnand %p2241_p11, %p2238_p10 }
  0x34   : > { %2246 = shalt.err (!%p2243_p12)
}
  0x35   : > { %s2247_s14 = scalar_lea.vmem %s2883_s22, 512  ;;  %p2255_p4 = scmp.lt.s32.totalorder %s2883_s22, %s2883_s22 }
  0x36   : > { %p2248_p13 = scmp.ne.s32.totalorder %s2883_s22, %s2247_s14  ;;  %p2256_p5 = scmp.lt.s32.totalorder %s2247_s14, %s2247_s14 }
  0x38   : > { %p2250_p0 = pnand %p2248_p13, %p2906_p8  ;;  %p2257_p7 = por %p2256_p5, %p2255_p4 }
  0x3a   : > { %p2251_p2 = pneg %p2250_p0 }
  0x3c   : > { %p2258_p9 = pnand %p2257_p7, %p2251_p2 }
  0x3e   : > { %2261 = shalt.err (!%p2258_p9)
}
  0x3f   : > { %s2747_s16 = smov 64   ;;  %s2748_s13 = smov 4  }
  0x40   : > { %2072 = dma.hbm_to_vmem [thread:$0]  (!%p2890_p6), %s3537_s3, 512, %s2883_s22, [#allocation11], %s2747_s16, %s2747_s16, %s2748_s13  }
  0x41   : > { %s3539_s5 = sld [smem:[#allocation49_spill]] }
  0x47   : > { %s2262_s14 = scalar_lea.hbm %s3539_s5, 512 }
  0x48   : > { %p2263_p5 = scmp.ne.s32.totalorder %s3539_s5, %s2262_s14  ;;  %p2269_p12 = scmp.lt.u32.totalorder %s2262_s14, %s3539_s5 }
  0x4a   : > { %p2265_p10 = pnand %p2263_p5, %p2906_p8 }
  0x4c   : > { %p2266_p11 = pneg %p2265_p10 }
  0x4e   : > { %p2271_p13 = pnand %p2269_p12, %p2266_p11 }
  0x50   : > { %2274 = shalt.err (!%p2271_p13)
}
  0x51   : > { %s2275_s22 = scalar_lea.vmem %s2894_s25, 512  ;;  %p2283_p7 = scmp.lt.s32.totalorder %s2894_s25, %s2894_s25 }
  0x52   : > { %p2276_p0 = scmp.ne.s32.totalorder %s2894_s25, %s2275_s22  ;;  %p2284_p9 = scmp.lt.s32.totalorder %s2275_s22, %s2275_s22 }
  0x54   : > { %p2278_p2 = pnand %p2276_p0, %p2906_p8  ;;  %p2285_p5 = por %p2284_p9, %p2283_p7 }
  0x56   : > { %p2279_p4 = pneg %p2278_p2 }
  0x58   : > { %p2286_p10 = pnand %p2285_p5, %p2279_p4 }
  0x5a   : > { %2289 = shalt.err (!%p2286_p10)
}
  0x5b   : > { %2078 = dma.hbm_to_vmem [thread:$0]  (!%p2890_p6), %s3539_s5, 512, %s2894_s25, [#allocation14], %s2747_s16, %s2747_s16, %s2748_s13  }
  0x5c   : > { %s3540_s7 = sld [smem:[#allocation50_spill]] }
  0x62   : > { %s2290_s28 = scalar_lea.hbm %s3540_s7, 512 }
  0x63   : > { %p2291_p11 = scmp.ne.s32.totalorder %s3540_s7, %s2290_s28  ;;  %p2297_p0 = scmp.lt.u32.totalorder %s2290_s28, %s3540_s7 }
  0x65   : > { %p2293_p12 = pnand %p2291_p11, %p2906_p8 }
  0x67   : > { %p2294_p13 = pneg %p2293_p12 }
  0x69   : > { %p2299_p2 = pnand %p2297_p0, %p2294_p13 }
  0x6b   : > { %2302 = shalt.err (!%p2299_p2)
}
  0x6c   : > { %s2303_s22 = scalar_lea.vmem %s470_s27, 512  ;;  %p2311_p5 = scmp.lt.s32.totalorder %s470_s27, %s470_s27 }
  0x6d   : > { %p2304_p4 = scmp.ne.s32.totalorder %s470_s27, %s2303_s22  ;;  %p2312_p10 = scmp.lt.s32.totalorder %s2303_s22, %s2303_s22 }
  0x6f   : > { %p2306_p7 = pnand %p2304_p4, %p2906_p8  ;;  %p2313_p1 = por %p2312_p10, %p2311_p5 }
  0x71   : > { %p2307_p9 = pneg %p2306_p7 }
  0x73   : > { %p2314_p3 = pnand %p2313_p1, %p2307_p9 }
  0x75   : > { %2317 = shalt.err (!%p2314_p3)
}
  0x76   : > { %2084 = dma.hbm_to_vmem [thread:$0]  (!%p2890_p6), %s3540_s7, 512, %s470_s27, [#allocation17], %s2747_s16, %s2747_s16, %s2748_s13  }
  0x77   : > { %s2749_s2 = smov [#allocation19]   ;;  %s2750_s12 = smov [#allocation22]  }
  0x78   : > { %s496_s10 = sshll.u32 %s2749_s2, 4  ;;  %s517_s28 = sshll.u32 %s2750_s12, 4  ;;  %s497_s10 = int_to_ptr.vmem [resolvable:$true] %s496_s10  ;;  %s518_s28 = int_to_ptr.vmem [resolvable:$true] %s517_s28 }
  0x79   : > { %s3541_s9 = sld [smem:[#allocation51_spill]] }
  0x7f   : > { %s2318_s26 = scalar_lea.hbm %s3541_s9, 16 }
  0x80   : > { %p2319_p1 = scmp.ne.s32.totalorder %s3541_s9, %s2318_s26  ;;  %p2325_p12 = scmp.lt.u32.totalorder %s2318_s26, %s3541_s9 }
  0x82   : > { %p2321_p3 = pnand %p2319_p1, %p2906_p8 }
  0x84   : > { %p2322_p11 = pneg %p2321_p3 }
  0x86   : > { %p2327_p13 = pnand %p2325_p12, %p2322_p11 }
  0x88   : > { %2330 = shalt.err (!%p2327_p13)
}
  0x89   : > { %s2331_s27 = scalar_lea.vmem %s497_s10, 16  ;;  %s2338_s0 = scalar_lea.vmem %s497_s10, 32 }
  0x8a   : > { %p2332_p0 = scmp.ne.s32.totalorder %s497_s10, %s2331_s27  ;;  %p2339_p7 = scmp.lt.s32.totalorder %s497_s10, %s497_s10 }
  0x8b   : > { %p2340_p9 = scmp.lt.s32.totalorder %s2338_s0, %s2331_s27 }
  0x8c   : > { %p2334_p2 = pnand %p2332_p0, %p2906_p8 }
  0x8d   : > { %p2341_p5 = por %p2340_p9, %p2339_p7 }
  0x8e   : > { %p2335_p4 = pneg %p2334_p2 }
  0x90   : > { %p2342_p10 = pnand %p2341_p5, %p2335_p4 }
  0x92   : > { %2345 = shalt.err (!%p2342_p10)
}
  0x93   : > { %2090 = dma.hbm_to_vmem [thread:$0]  (!%p2890_p6), %s3541_s9, 16, %s497_s10, [#allocation20]  }
  0x94   : > { %s3542_s11 = sld [smem:[#allocation53_spill]] }
  0x9a   : > { %s2346_s24 = scalar_lea.hbm %s3542_s11, 256 }
  0x9b   : > { %p2347_p1 = scmp.ne.s32.totalorder %s3542_s11, %s2346_s24  ;;  %p2353_p12 = scmp.lt.u32.totalorder %s2346_s24, %s3542_s11 }
  0x9d   : > { %p2349_p3 = pnand %p2347_p1, %p2906_p8 }
  0x9f   : > { %p2350_p11 = pneg %p2349_p3 }
  0xa1   : > { %p2355_p13 = pnand %p2353_p12, %p2350_p11 }
  0xa3   : > { %2358 = shalt.err (!%p2355_p13)
}
  0xa4   : > { %s2359_s27 = scalar_lea.vmem %s518_s28, 256  ;;  %p2367_p7 = scmp.lt.s32.totalorder %s518_s28, %s518_s28 }
  0xa5   : > { %p2360_p0 = scmp.ne.s32.totalorder %s518_s28, %s2359_s27  ;;  %p2368_p9 = scmp.lt.s32.totalorder %s2359_s27, %s2359_s27 }
  0xa7   : > { %p2362_p2 = pnand %p2360_p0, %p2906_p8  ;;  %p2369_p5 = por %p2368_p9, %p2367_p7 }
  0xa9   : > { %p2363_p4 = pneg %p2362_p2 }
  0xab   : > { %p2370_p10 = pnand %p2369_p5, %p2363_p4 }
  0xad   : > { %2373 = shalt.err (!%p2370_p10)
}
  0xae   : > { %2096 = dma.hbm_to_vmem [thread:$0]  (!%p2890_p6), %s3542_s11, 256, %s518_s28, [#allocation23], %s2747_s16, %s2747_s16, %s2748_s13  }
  0xaf   : > { %s1829_s2 = sadd.s32 4294967294, %s2742_s18   ;;  %s54_s12 = sadd.s32 1, %s2738_s17 }
  0xb0   : > { %s63_s3 = sadd.s32 1, %s2730_s15  ;;  %p56_p1 = scmp.ge.s32.totalorder %s54_s12, 2 }
  0xb1   : > { %p70_p3 = scmp.ne.s32.totalorder %s2730_s15, %s2726_s30  ;;  %p71_p11 = scmp.eq.s32.totalorder %s2742_s18, 0 }
  0xb2   : > { %p76_p12 = scmp.ne.s32.totalorder %s2726_s30, %s2722_s29  ;;  %s3593_s12 = smov (%p56_p1, %s54_s12), 0 }
  0xb3   : > { %3543 = sst [smem:[#allocation42_spill]] %s3593_s12  ;;  %p3027_p13 = por %p71_p11, %p70_p3 }
  0xb4   : > { %p3545_p0 = scmp.eq.s32.totalorder %s2874_s19, 0  ;;  %s58_s13 = ssub.s32 %s2738_s17, %s3593_s12 }
  0xb5   : > { %p364_p4 = scmp.eq.s32.totalorder %s2874_s19, 1  ;;  %p61_p7 = scmp.eq.s32.totalorder %s58_s13, 0 }
  0xb6   : > { %p3033_p2 = por %p3545_p0, %p76_p12  ;;  %p370_p9 = scmp.eq.s32.totalorder %s1829_s2, 1 }
  0xb7   : > { %p3040_p5 = por %p364_p4, %p70_p3  ;;  %p2127_p10 = scmp.lt.s32.totalorder %s2742_s18, 2 }
  0xb8   : > { %s3546_s16 = scalar_select %p3033_p2, 1, 0 }
  0xb9   : > { %s3547_s28 = scalar_select %p3040_p5, 1, 0 }
  0xba   : > { %s3046_s24 = scalar_select %p61_p7, %s2730_s15, %s63_s3  }
  0xbb   : > { %p3048_p1 = por %p370_p9, %p76_p12  ;;  %s3501_s14 = sand.u32 1, %s2730_s15  }
  0xbc   : > { %3548 = sst [smem:[#allocation43_spill]] %s3046_s24  ;;  %s3055_s22 = sshll.u32 %s3501_s14, 3 }
  0xbd   : > { %s3549_s26 = scalar_select %p3048_p1, 1, 0 }
  0xbe   : > { %s3058_s25 = sshll.u32 %s2738_s17, 7  ;;  %p3062_p3 = pnand %p2127_p10, %p3027_p13 }
  0xbf   : > { %3550 = sst [smem:[#allocation44_spill]] %s3549_s26  ;;  %s561_s10 = sand.u32 1, %s2742_s18  }
  0xc0   : > { %s3551_s27 = scalar_select %p3062_p3, 1, 0 }
  0xc1   : > { %s3552_s1 = sld [smem:[#allocation46_spill]]  ;;  %s565_s13 = scalar_lea.vmem [#allocation7], %s3055_s22 }
  0xc2   : > { %s572_s14 = sshll.u32 %s565_s13, 4  ;;  %s2751_s21 = smov [#allocation12]   ;;  %s3074_s14 = int_to_ptr.vmem [resolvable:$true] %s572_s14 }
  0xc3   : > { %s3076_s5 = sshll.u32 %s2751_s21, 4  ;;  %s3078_s7 = scalar_lea.sflag [#allocation8], %s561_s10  ;;  %s431_s5 = int_to_ptr.vmem [resolvable:$true] %s3076_s5 }
  0xc4   : > { %p3084_p12 = pneg %p3062_p3 }
  0xc6   : > { %s3553_s0 = scalar_select %p3084_p12, 1, 0 }
  0xc7   : > { %s3071_s3 = scalar_lea.hbm %s3552_s1, %s3058_s25  ;;  %s2379_s11 = scalar_lea.hbm %s3552_s1, 256 }
  0xc8   : > { %s2374_s9 = scalar_lea.hbm %s3071_s3, 128  ;;  %p2380_p4 = scmp.lt.u32.totalorder %s3071_s3, %s3552_s1 }
  0xc9   : > { %p2375_p11 = scmp.ne.s32.totalorder %s3071_s3, %s2374_s9  ;;  %p2381_p7 = scmp.lt.u32.totalorder %s2379_s11, %s2374_s9 }
  0xca   : > { %p2383_p10 = scmp.lt.u32.totalorder %s2374_s9, %s3071_s3 }
  0xcb   : > { %p2377_p13 = pnand %p3084_p12, %p2375_p11  ;;  %p2382_p9 = por %p2381_p7, %p2380_p4 }
  0xcd   : > { %p2378_p0 = pneg %p2377_p13  ;;  %p2384_p1 = por %p2383_p10, %p2382_p9 }
  0xcf   : > { %p2385_p5 = pnand %p2384_p1, %p2378_p0 }
  0xd1   : > { %2388 = shalt.err (!%p2385_p5)
}
  0xd2   : > { %s2389_s10 = scalar_lea.vmem %s3074_s14, 128  ;;  %s2752_s2 = smov [#allocation7]  }
  0xd3   : > { %p2390_p11 = scmp.ne.s32.totalorder %s3074_s14, %s2389_s10  ;;  %s2394_s13 = sshll.u32 %s2752_s2, 4  ;;  %s2395_s13 = int_to_ptr.vmem [resolvable:$false] %s2394_s13 }
  0xd4   : > { %s2396_s12 = scalar_lea.vmem %s2395_s13, 256  ;;  %p2397_p6 = scmp.lt.s32.totalorder %s3074_s14, %s2395_s13 }
  0xd5   : > { %p2392_p13 = pnand %p2390_p11, %p3084_p12  ;;  %p2398_p8 = scmp.lt.s32.totalorder %s2396_s12, %s2389_s10 }
  0xd7   : > { %p2393_p2 = pneg %p2392_p13  ;;  %p2399_p4 = por %p2398_p8, %p2397_p6 }
  0xd9   : > { %p2400_p7 = pnand %p2399_p4, %p2393_p2 }
  0xdb   : > { %2403 = shalt.err (!%p2400_p7)
}
  0xdc   : > { %2106 = dma.hbm_to_vmem [thread:$0]  (!%p3062_p3), %s3071_s3, 128, %s3074_s14, %s3078_s7  }
  0xdd   : > { %s2404_s21 = scalar_lea.hbm %s3480_s4, 32  ;;  %p3554_p6 = scmp.ne.s32.totalorder %s3538_s20, 0 }
  0xde   : > { %p2405_p5 = scmp.ne.s32.totalorder %s3480_s4, %s2404_s21  ;;  %p2411_p1 = scmp.lt.u32.totalorder %s2404_s21, %s3480_s4 }
  0xe0   : > { %p2407_p8 = pnand %p2405_p5, %p3554_p6 }
  0xe2   : > { %p2408_p2 = pneg %p2407_p8 }
  0xe4   : > { %p2413_p0 = pnand %p2411_p1, %p2408_p2 }
  0xe6   : > { %2416 = shalt.err (!%p2413_p0)
}
  0xe7   : > { %s2417_s12 = scalar_lea.vmem %s431_s5, 32  ;;  %p2425_p13 = scmp.lt.s32.totalorder %s431_s5, %s431_s5 }
  0xe8   : > { %p2418_p9 = scmp.ne.s32.totalorder %s431_s5, %s2417_s12  ;;  %p2426_p4 = scmp.lt.s32.totalorder %s2417_s12, %s2417_s12 }
  0xea   : > { %p2420_p10 = pnand %p2418_p9, %p3554_p6  ;;  %p2427_p7 = por %p2426_p4, %p2425_p13 }
  0xec   : > { %p2421_p11 = pneg %p2420_p10 }
  0xee   : > { %p2428_p3 = pnand %p2427_p7, %p2421_p11 }
  0xf0   : > { %2431 = shalt.err (!%p2428_p3)
}
  0xf1   : > { %s2753_s1 = smov 16   ;;  %s2754_s14 = smov 1  }
  0xf2   : > { %p3555_p5 = scmp.ne.s32.totalorder %s3536_s23, 0  ;;  %s2755_s11 = smov [#allocation15]  }
  0xf3   : > { %s456_s21 = sshll.u32 %s2755_s11, 4  ;;  %s2756_s2 = smov [#allocation18]   ;;  %s457_s21 = int_to_ptr.vmem [resolvable:$true] %s456_s21 }
  0xf4   : > { %2075 = dma.hbm_to_vmem [thread:$0]  (!%p3555_p5), %s3480_s4, 32, %s431_s5, [#allocation11], %s2753_s1, %s2753_s1, %s2754_s14  }
  0xf5   : > { %s482_s10 = sshll.u32 %s2756_s2, 4  ;;  %s2432_s17 = scalar_lea.hbm %s3482_s6, 32  ;;  %s483_s10 = int_to_ptr.vmem [resolvable:$true] %s482_s10 }
  0xf6   : > { %p2433_p3 = scmp.ne.s32.totalorder %s3482_s6, %s2432_s17  ;;  %p2439_p1 = scmp.lt.u32.totalorder %s2432_s17, %s3482_s6 }
  0xf8   : > { %p2435_p8 = pnand %p2433_p3, %p3554_p6 }
  0xfa   : > { %p2436_p2 = pneg %p2435_p8 }
  0xfc   : > { %p2441_p0 = pnand %p2439_p1, %p2436_p2 }
  0xfe   : > { %2444 = shalt.err (!%p2441_p0)
}
  0xff   : > { %s2445_s5 = scalar_lea.vmem %s457_s21, 32  ;;  %p2453_p13 = scmp.lt.s32.totalorder %s457_s21, %s457_s21 }
 0x100   : > { %p2446_p9 = scmp.ne.s32.totalorder %s457_s21, %s2445_s5  ;;  %p2454_p4 = scmp.lt.s32.totalorder %s2445_s5, %s2445_s5 }
 0x102   : > { %p2448_p10 = pnand %p2446_p9, %p3554_p6  ;;  %p2455_p7 = por %p2454_p4, %p2453_p13 }
 0x104   : > { %p2449_p11 = pneg %p2448_p10 }
 0x106   : > { %p2456_p12 = pnand %p2455_p7, %p2449_p11 }
 0x108   : > { %2459 = shalt.err (!%p2456_p12)
}
 0x109   : > { %2081 = dma.hbm_to_vmem [thread:$0]  (!%p3555_p5), %s3482_s6, 32, %s457_s21, [#allocation14], %s2753_s1, %s2753_s1, %s2754_s14  }
 0x10a   : > { %s2460_s26 = scalar_lea.hbm %s3484_s8, 32 }
 0x10b   : > { %p2461_p3 = scmp.ne.s32.totalorder %s3484_s8, %s2460_s26  ;;  %p2467_p2 = scmp.lt.u32.totalorder %s2460_s26, %s3484_s8 }
 0x10d   : > { %p2463_p12 = pnand %p2461_p3, %p3554_p6 }
 0x10f   : > { %p2464_p8 = pneg %p2463_p12 }
 0x111   : > { %p2469_p1 = pnand %p2467_p2, %p2464_p8 }
 0x113   : > { %2472 = shalt.err (!%p2469_p1)
}
 0x114   : > { %s2473_s13 = scalar_lea.vmem %s483_s10, 32  ;;  %p2481_p11 = scmp.lt.s32.totalorder %s483_s10, %s483_s10 }
 0x115   : > { %p2474_p0 = scmp.ne.s32.totalorder %s483_s10, %s2473_s13  ;;  %p2482_p13 = scmp.lt.s32.totalorder %s2473_s13, %s2473_s13 }
 0x117   : > { %p2476_p9 = pnand %p2474_p0, %p3554_p6  ;;  %p2483_p4 = por %p2482_p13, %p2481_p11 }
 0x119   : > { %p2477_p10 = pneg %p2476_p9 }
 0x11b   : > { %p2484_p7 = pnand %p2483_p4, %p2477_p10 }
 0x11d   : > { %2487 = shalt.err (!%p2484_p7)
}
 0x11e   : > { %2087 = dma.hbm_to_vmem [thread:$0]  (!%p3555_p5), %s3484_s8, 32, %s483_s10, [#allocation17], %s2753_s1, %s2753_s1, %s2754_s14  }
 0x11f   : > { %s2757_s5 = smov [#allocation21]   ;;  %s2758_s17 = smov [#allocation24]  }
 0x120   : > { %s507_s29 = sshll.u32 %s2757_s5, 4  ;;  %s531_s18 = sshll.u32 %s2758_s17, 4  ;;  %s508_s29 = int_to_ptr.vmem [resolvable:$true] %s507_s29  ;;  %s532_s18 = int_to_ptr.vmem [resolvable:$true] %s531_s18 }
 0x121   : > { %s3556_s3 = sld [smem:[#allocation52_spill]] }
 0x127   : > { %s2488_s9 = scalar_lea.hbm %s3556_s3, 16 }
 0x128   : > { %p2489_p3 = scmp.ne.s32.totalorder %s3556_s3, %s2488_s9  ;;  %p2495_p2 = scmp.lt.u32.totalorder %s2488_s9, %s3556_s3 }
 0x12a   : > { %p2491_p12 = pnand %p2489_p3, %p3554_p6 }
 0x12c   : > { %p2492_p8 = pneg %p2491_p12 }
 0x12e   : > { %p2497_p1 = pnand %p2495_p2, %p2492_p8 }
 0x130   : > { %2500 = shalt.err (!%p2497_p1)
}
 0x131   : > { %s2501_s1 = scalar_lea.vmem %s508_s29, 16  ;;  %s2508_s14 = scalar_lea.vmem %s508_s29, 32 }
 0x132   : > { %p2502_p0 = scmp.ne.s32.totalorder %s508_s29, %s2501_s1  ;;  %p2509_p11 = scmp.lt.s32.totalorder %s508_s29, %s508_s29 }
 0x133   : > { %p2510_p13 = scmp.lt.s32.totalorder %s2508_s14, %s2501_s1 }
 0x134   : > { %p2504_p9 = pnand %p2502_p0, %p3554_p6 }
 0x135   : > { %p2511_p4 = por %p2510_p13, %p2509_p11 }
 0x136   : > { %p2505_p10 = pneg %p2504_p9 }
 0x138   : > { %p2512_p7 = pnand %p2511_p4, %p2505_p10 }
 0x13a   : > { %2515 = shalt.err (!%p2512_p7)
}
 0x13b   : > { %2093 = dma.hbm_to_vmem [thread:$0]  (!%p3555_p5), %s3556_s3, 16, %s508_s29, [#allocation20]  }
 0x13c   : > { %s3557_s24 = sld [smem:[#allocation54_spill]] }
 0x142   : > { %s2516_s26 = scalar_lea.hbm %s3557_s24, 16 }
 0x143   : > { %p2517_p3 = scmp.ne.s32.totalorder %s3557_s24, %s2516_s26  ;;  %p2523_p2 = scmp.lt.u32.totalorder %s2516_s26, %s3557_s24 }
 0x145   : > { %p2519_p12 = pnand %p2517_p3, %p3554_p6 }
 0x147   : > { %p2520_p8 = pneg %p2519_p12 }
 0x149   : > { %p2525_p1 = pnand %p2523_p2, %p2520_p8 }
 0x14b   : > { %2528 = shalt.err (!%p2525_p1)
}
 0x14c   : > { %s2529_s21 = scalar_lea.vmem %s532_s18, 16  ;;  %s2536_s29 = scalar_lea.vmem %s532_s18, 32 }
 0x14d   : > { %p2530_p0 = scmp.ne.s32.totalorder %s532_s18, %s2529_s21  ;;  %p2537_p11 = scmp.lt.s32.totalorder %s532_s18, %s532_s18 }
 0x14e   : > { %p2538_p13 = scmp.lt.s32.totalorder %s2536_s29, %s2529_s21 }
 0x14f   : > { %p2532_p9 = pnand %p2530_p0, %p3554_p6 }
 0x150   : > { %p2539_p4 = por %p2538_p13, %p2537_p11 }
 0x151   : > { %p2533_p10 = pneg %p2532_p9 }
 0x153   : > { %p2540_p7 = pnand %p2539_p4, %p2533_p10 }
 0x155   : > { %2543 = shalt.err (!%p2540_p7)
}
 0x156   : > { %2099 = dma.hbm_to_vmem [thread:$0]  (!%p3555_p5), %s3557_s24, 16, %s532_s18, [#allocation23]  }
 0x157   : > { %s3558_s12 = sld [smem:[#allocation45_spill]]  ;;  %s546_s17 = scalar_lea.vmem [#allocation4], %s3055_s22 }
 0x158   : > { %s554_s23 = sshll.u32 %s546_s17, 4  ;;  %s3559_s11 = sld [smem:[#allocation47_spill]]  ;;  %s3215_s23 = int_to_ptr.vmem [resolvable:$true] %s554_s23 }
 0x159   : > { %s3560_s13 = sand.u32 1, %s2730_s15   ;;  %p3561_p5 = scmp.ne.s32.totalorder %s3553_s0, 0 }
 0x15a   : > { %s543_s18 = scalar_lea.sflag [#allocation5], %s3560_s13 }
 0x15d   : > { %s3212_s5 = scalar_lea.hbm %s3558_s12, %s3058_s25  ;;  %s2549_s14 = scalar_lea.hbm %s3558_s12, 256 }
 0x15e   : > { %s3221_s2 = scalar_lea.hbm %s3559_s11, %s3058_s25  ;;  %s2544_s21 = scalar_lea.hbm %s3212_s5, 128 }
 0x15f   : > { %p2545_p6 = scmp.ne.s32.totalorder %s3212_s5, %s2544_s21  ;;  %p2550_p8 = scmp.lt.u32.totalorder %s3212_s5, %s3558_s12 }
 0x160   : > { %p2551_p2 = scmp.lt.u32.totalorder %s2549_s14, %s2544_s21  ;;  %p2553_p0 = scmp.lt.u32.totalorder %s2544_s21, %s3212_s5 }
 0x161   : > { %p2547_p3 = pnand %p2545_p6, %p3561_p5 }
 0x162   : > { %p2552_p1 = por %p2551_p2, %p2550_p8 }
 0x163   : > { %p2548_p12 = pneg %p2547_p3 }
 0x164   : > { %p2554_p9 = por %p2553_p0, %p2552_p1 }
 0x166   : > { %p2555_p10 = pnand %p2554_p9, %p2548_p12 }
 0x168   : > { %2558 = shalt.err (!%p2555_p10)
}
 0x169   : > { %s2559_s25 = scalar_lea.vmem %s3215_s23, 128  ;;  %s2759_s17 = smov [#allocation4]  }
 0x16a   : > { %p2560_p11 = scmp.ne.s32.totalorder %s3215_s23, %s2559_s25  ;;  %s2564_s26 = sshll.u32 %s2759_s17, 4  ;;  %s2565_s26 = int_to_ptr.vmem [resolvable:$false] %s2564_s26 }
 0x16b   : > { %s2566_s9 = scalar_lea.vmem %s2565_s26, 256  ;;  %p2567_p7 = scmp.lt.s32.totalorder %s3215_s23, %s2565_s26 }
 0x16c   : > { %p2562_p13 = pnand %p2560_p11, %p3561_p5  ;;  %p2568_p6 = scmp.lt.s32.totalorder %s2566_s9, %s2559_s25 }
 0x16e   : > { %p2563_p4 = pneg %p2562_p13  ;;  %p2569_p3 = por %p2568_p6, %p2567_p7 }
 0x170   : > { %p2570_p8 = pnand %p2569_p3, %p2563_p4 }
 0x172   : > { %2573 = shalt.err (!%p2570_p8)
}
 0x173   : > { %p3562_p12 = scmp.ne.s32.totalorder %s3551_s27, 0  ;;  %s583_s13 = scalar_lea.vmem [#allocation9], %s3055_s22 }
 0x174   : > { %s590_s21 = sshll.u32 %s583_s13, 4  ;;  %s2574_s29 = scalar_lea.hbm %s3221_s2, 128  ;;  %s591_s21 = int_to_ptr.vmem [resolvable:$true] %s590_s21 }
 0x175   : > { %2103 = dma.hbm_to_vmem [thread:$0]  (!%p3562_p12), %s3212_s5, 128, %s3215_s23, %s543_s18  }
 0x176   : > { %p2575_p2 = scmp.ne.s32.totalorder %s3221_s2, %s2574_s29  ;;  %s2579_s20 = scalar_lea.hbm %s3559_s11, 256 }
 0x177   : > { %p2580_p9 = scmp.lt.u32.totalorder %s3221_s2, %s3559_s11  ;;  %p2581_p10 = scmp.lt.u32.totalorder %s2579_s20, %s2574_s29 }
 0x178   : > { %p2577_p1 = pnand %p2575_p2, %p3561_p5  ;;  %p2583_p13 = scmp.lt.u32.totalorder %s2574_s29, %s3221_s2 }
 0x179   : > { %p2582_p11 = por %p2581_p10, %p2580_p9 }
 0x17a   : > { %p2578_p0 = pneg %p2577_p1 }
 0x17b   : > { %p2584_p4 = por %p2583_p13, %p2582_p11 }
 0x17d   : > { %p2585_p7 = pnand %p2584_p4, %p2578_p0 }
 0x17f   : > { %2588 = shalt.err (!%p2585_p7)
}
 0x180   : > { %s2589_s22 = scalar_lea.vmem %s591_s21, 128  ;;  %s2760_s5 = smov [#allocation9]  }
 0x181   : > { %p2590_p6 = scmp.ne.s32.totalorder %s591_s21, %s2589_s22  ;;  %s2594_s23 = sshll.u32 %s2760_s5, 4  ;;  %s2595_s23 = int_to_ptr.vmem [resolvable:$false] %s2594_s23 }
 0x182   : > { %s2596_s18 = scalar_lea.vmem %s2595_s23, 256  ;;  %p2597_p2 = scmp.lt.s32.totalorder %s591_s21, %s2595_s23 }
 0x183   : > { %p2592_p3 = pnand %p2590_p6, %p3561_p5  ;;  %p2598_p1 = scmp.lt.s32.totalorder %s2596_s18, %s2589_s22 }
 0x185   : > { %p2593_p8 = pneg %p2592_p3  ;;  %p2599_p12 = por %p2598_p1, %p2597_p2 }
 0x187   : > { %p2600_p9 = pnand %p2599_p12, %p2593_p8 }
 0x189   : > { %2603 = shalt.err (!%p2600_p9)
}
 0x18a   : > { %p3563_p10 = scmp.ne.s32.totalorder %s3551_s27, 0  ;;  %s3564_s17 = sld [smem:[#allocation41_spill]] }
 0x18c   : > { %2109 = dma.hbm_to_vmem [thread:$0]  (!%p3563_p10), %s3221_s2, 128, %s591_s21, %s3078_s7  }
 0x190   : > { %p3565_p0 = scmp.ne.s32.totalorder %s3564_s17, 0 }
 0x191   : > { %s3268_s0 = sand.u32 (!%p3565_p0), 1, %s2726_s30   ;;  %p3566_p5 = scmp.ne.s32.totalorder (!%p3565_p0), %s3546_s16, 0 }
 0x192   : > { %599 = sbr.rel (%p3565_p0) target bundleno = 1953 (0x7a1), region = 72  ;;  %s3271_s26 = sshll.u32 (!%p3565_p0), %s3268_s0, 3 }
 0x193   : > { %s602_s9 = scalar_lea.sflag (!%p3565_p0), [#allocation5], %s3268_s0  ;;  %s605_s13 = scalar_lea.vmem (!%p3565_p0), [#allocation4], %s3271_s26 }
 0x199   : > { %2685 = dma.done.wait (%p3566_p5), %s602_s9, 128  }
 0x19a   : > { %2687 = vsyncadd (%p3566_p5), %s602_s9, 4294967168  ;;  %s610_s7 = sand.u32 1, %s2874_s19   ;;  %s614_s2 = scalar_lea.vmem [#allocation7], %s3271_s26 }
 0x19b   : > { %s611_s27 = scalar_lea.sflag [#allocation8], %s610_s7 }
 0x19c   : > { %2689 = dma.done.wait (%p3566_p5), %s611_s27, 256  }
 0x19d   : > { %2691 = vsyncadd (%p3566_p5), %s611_s27, 4294967040  ;;  %s623_s21 = scalar_lea.vmem [#allocation9], %s3271_s26  ;;  %p3567_p12 = scmp.eq.s32.totalorder %s2874_s19, 0 }
 0x19f   : > { %2693 = dma.done.wait (%p3567_p12), [#allocation11], 544   ;;  %p3568_p11 = pmov %p3567_p12 }
 0x1a1   : > { %2695 = vsyncadd (%p3568_p11), [#allocation11], 4294966752  ;;  %p3569_p13 = pmov %p3568_p11 }
 0x1a2   : > { %p3570_p4 = pmov %p3568_p11 }
 0x1a3   : > { %2697 = dma.done.wait (%p3569_p13), [#allocation14], 544  }
 0x1a4   : > { %2699 = vsyncadd (%p3570_p4), [#allocation14], 4294966752  ;;  %p3571_p7 = pmov %p3570_p4 }
 0x1a5   : > { %p3572_p6 = pmov %p3570_p4 }
 0x1a6   : > { %2701 = dma.done.wait (%p3571_p7), [#allocation17], 544  }
 0x1a7   : > { %2703 = vsyncadd (%p3572_p6), [#allocation17], 4294966752  ;;  %p3573_p3 = pmov %p3570_p4 }
 0x1a9   : > { %2705 = dma.done.wait (%p3573_p3), [#allocation20], 32   ;;  %p3574_p8 = pmov %p3573_p3 }
 0x1aa   : > { %p3575_p2 = pmov %p3573_p3 }
 0x1ab   : > { %2707 = vsyncadd (%p3574_p8), [#allocation20], 4294967264 }
 0x1ac   : > { %2709 = dma.done.wait (%p3575_p2), [#allocation23], 272   ;;  %p3576_p1 = pmov %p3575_p2 }
 0x1ad   : > { %vm731_vm0 = vcmask 261120   ;;  %v730_v0 = vld [vmem:[%s614_s2] sm:$0xff]  ;;  %v3306_v1 = vld [vmem:[%s605_s13] sm:$0xff]  ;;  %v2761_v23 = vmov 0.0   ;;  %vm2762_vm1 = vmmov 0   ;;  %vm1038_vm2 = vcmask 125952  }
 0x1ae   : > { %2711 = vsyncadd (%p3576_p1), [#allocation23], 4294967024  ;;  %v761_v2 = vld [vmem:[%s623_s21] sm:$0xff]  ;;  %v732_v3 = vsel %vm731_vm0, %v730_v0, 0.0  ;;  %v1047_v4 = vsel %vm731_vm0, %v3306_v1, 0.0  ;;  %v2206_v21 = vld [vmem:[#allocation13] sm:$0xff]   ;;  %1935 = vmatprep.subr.bf16.mxu0 %v2761_v23  ;;  %1943 = vmatprep.subr.bf16.mxu1 %v2761_v23 }
 0x1af   : > { %v762_v5 = vsel %vm731_vm0, %v761_v2, 0.0  ;;  %733 = vadd.xlane.f32.xlu0 %v732_v3  ;;  %1048 = vadd.xlane.f32.xlu1 %v1047_v4  ;;  %v2207_v22 = vld [vmem:[#allocation13 + $0x10] sm:$0xff]   ;;  %v2208_v24 = vld [vmem:[#allocation13 + $0x8] sm:$0xff]   ;;  %v2209_v25 = vld [vmem:[#allocation13 + $0x18] sm:$0xff]   ;;  %vm1209_vm3 = vcmask 130048   ;;  %vm1334_vm4 = vcmask 1043456  }
 0x1b0   : > { %1936 = vmatpush3.bf16.msra.mxu0 %v2206_v21  ;;  %1944 = vmatpush3.bf16.msra.mxu1 %v2207_v22  ;;  %v1903_v36 = vld [vmem:[#allocation19] ss:$0 sm:$0xff]  ;;  %v1904_v38 = vld [vmem:[#allocation21] ss:$0 sm:$0xff]  ;;  %v2211_v44 = vld [vmem:[#allocation16 + $0x10] sm:$0xff]   ;;  %vm1302_vm5 = vcmask 64512  }
 0x1b1   : > { %1937 = vmatprep.subr.bf16.mxu0 %v2761_v23  ;;  %1945 = vmatprep.subr.bf16.mxu1 %v2761_v23  ;;  %v2210_v43 = vld [vmem:[#allocation16] sm:$0xff]   ;;  %v2212_v48 = vld [vmem:[#allocation16 + $0x8] sm:$0xff]   ;;  %v2213_v49 = vld [vmem:[#allocation16 + $0x18] sm:$0xff]   ;;  %s1863_s19 = sshll.u32 %s3268_s0, 4  ;;  %s3577_s29 = sld [smem:[#allocation38_spill]] }
 0x1b2   : > { %1939 = vmatprep.mubr.msk.bf16.mxu0 %vm2762_vm1, %v2761_v23  ;;  %1947 = vmatprep.mubr.msk.bf16.mxu1 %vm2762_vm1, %v2761_v23  ;;  %v2214_v52 = vld [vmem:[#allocation10] sm:$0xff]   ;;  %v2215_v53 = vld [vmem:[#allocation10 + $0x10] sm:$0xff]   ;;  %v2216_v56 = vld [vmem:[#allocation10 + $0x8] sm:$0xff]   ;;  %s722_s16 = scalar_lea.vmem [#allocation26], %s1863_s19  ;;  %s3578_s10 = sld [smem:[#allocation56_spill]] }
 0x1b3   : > { %763 = vadd.xlane.f32.xlu0 %v762_v5  ;;  %v2217_v57 = vld [vmem:[#allocation10 + $0x18] sm:$0xff]   ;;  %v1864_v60 = vld [vmem:[#allocation15] ss:$0 sm:$0xff]  ;;  %v1865_v61 = vld [vmem:[#allocation15 + $0x1] ss:$0 sm:$0xff]  ;;  %s1574_s22 = sshll.u32 %s722_s16, 4  ;;  %s3391_s22 = int_to_ptr.vmem [resolvable:$true] %s1574_s22 }
 0x1b4   : > { %1938 = vmatpush3.bf16.msra.mxu0 %v2208_v24  ;;  %1946 = vmatpush3.bf16.msra.mxu1 %v2209_v25  ;;  %s1547_s5 = scalar_lea.sflag [#allocation27], %s3268_s0  ;;  %s2604_s23 = scalar_lea.vmem %s3391_s22, 256 }
 0x1b5   : > { %1951 = vmatprep.subr.bf16.mxu0 %v2761_v23  ;;  %1959 = vmatprep.subr.bf16.mxu1 %v2761_v23  ;;  %p2605_p9 = scmp.ne.s32.totalorder %s3391_s22, %s2604_s23  ;;  %p3579_p10 = scmp.ne.s32.totalorder %s3547_s28, 0 }
 0x1b6   : > { %s2763_s18 = smov [#allocation26]  }
 0x1b7   : > { %s1899_s1 = sshll.u32 %s3577_s29, 7  ;;  %p2606_p0 = pnand %p2605_p9, %p3579_p10 }
 0x1b8   : > { %s3389_s25 = scalar_lea.hbm %s3578_s10, %s1899_s1  ;;  %s2608_s17 = sshll.u32 %s2763_s18, 4  ;;  %s2609_s17 = int_to_ptr.vmem [resolvable:$false] %s2608_s17 }
 0x1b9   : > { %p2607_p5 = pneg %p2606_p0  ;;  %s2610_s9 = scalar_lea.vmem %s2609_s17, 512 }
 0x1ba   : > { %p2611_p12 = scmp.lt.s32.totalorder %s3391_s22, %s2609_s17  ;;  %p2612_p11 = scmp.lt.s32.totalorder %s2610_s9, %s2604_s23 }
 0x1bc   : > { %p2613_p13 = por %p2612_p11, %p2611_p12 }
 0x1be   : > { %p2614_p4 = pnand %p2613_p13, %p2607_p5 }
 0x23c   : > { %v734_v6 = vpop.xlane.xlu0 %733  ;;  %v1049_v7 = vpop.xlane.xlu1 %1048 }
 0x23d   : > { %v736_v8 = vmul.f32 0.03125, %v734_v6  ;;  %v1051_v9 = vmul.f32 0.03125, %v1049_v7 }
 0x23f   : > { %v737_v10 = vsub.f32 %v730_v0, %v736_v8  ;;  %v1052_v11 = vsub.f32 %v3306_v1, %v1051_v9 }
 0x240   : > { %v764_v12 = vpop.xlane.xlu0 %763 }
 0x241   : > { %v765_v13 = vmul.f32 0.03125, %v764_v12  ;;  %v738_v14 = vmul.f32 %v737_v10, %v737_v10  ;;  %v1053_v15 = vmul.f32 %v1052_v11, %v1052_v11  ;;  %v1873_v12 = vld [vmem:[#allocation18 + $0x1] ss:$0 sm:$0xff] }
 0x243   : > { %v766_v16 = vsub.f32 %v761_v2, %v765_v13  ;;  %v739_v17 = vsel %vm731_vm0, %v738_v14, 0.0  ;;  %v1054_v18 = vsel %vm731_vm0, %v1053_v15, 0.0 }
 0x244   : > { %740 = vadd.xlane.f32.xlu1 %v739_v17 }
 0x245   : > { %v767_v19 = vmul.f32 %v766_v16, %v766_v16 }
 0x247   : > { %v768_v20 = vsel %vm731_vm0, %v767_v19, 0.0 }
 0x248   : > { %1055 = vadd.xlane.f32.xlu1 %v1054_v18  ;;  %769 = vadd.xlane.f32.xlu0 %v768_v20 }
 0x2d1   : > { %v741_v26 = vpop.xlane.xlu1 %740 }
 0x2d2   : > { %v742_v27 = vmul.f32 0.03125, %v741_v26 }
 0x2d4   : > { %v743_v28 = vadd.f32 1e-05, %v742_v27 }
 0x2d5   : > { %v1056_v29 = vpop.xlane.xlu1 %1055  ;;  %v770_v30 = vpop.xlane.xlu0 %769 }
 0x2d6   : > { %2220 = vrsqrt.f32 %v743_v28  ;;  %v1057_v31 = vmul.f32 0.03125, %v1056_v29  ;;  %v771_v32 = vmul.f32 0.03125, %v770_v30  ;;  %v1880_v30 = vld [vmem:[#allocation12] ss:$0 sm:$0xff] }
 0x2d8   : > { %v772_v33 = vadd.f32 1e-05, %v771_v32  ;;  %v1058_v34 = vadd.f32 1e-05, %v1057_v31  ;;  %v1881_v31 = vld [vmem:[#allocation12 + $0x1] ss:$0 sm:$0xff] }
 0x2da   : > { %2222 = vrsqrt.f32 %v772_v33 }
 0x2db   : > { %2224 = vrsqrt.f32 %v1058_v34 }
 0x2e0   : > { %v2221_v35 = vpop.eup %2220 }
 0x2e1   : > { %v745_v37 = vmul.f32 %v2221_v35, %v737_v10 }
 0x2e3   : > { %v752_v39 = vmul.f32 %v1903_v36, %v745_v37 }
 0x2e4   : > { %v2223_v40 = vpop.eup %2222 }
 0x2e5   : > { %v759_v41 = vadd.f32 %v1904_v38, %v752_v39  ;;  %v774_v42 = vmul.f32 %v2223_v40, %v766_v16  ;;  %v2225_v46 = vpop.eup %2224 }
 0x2e6   : > { %v1060_v50 = vmul.f32 %v2225_v46, %v1052_v11  ;;  %v1872_v11 = vld [vmem:[#allocation18] ss:$0 sm:$0xff] }
 0x2e7   : > { %v760_v45 = vpack.c.bf16 %v759_v41, %v759_v41  ;;  %v775_v47 = vmul.f32 %v1903_v36, %v774_v42 }
 0x2e8   : > { %v1067_v55 = vmul.f32 %v1903_v36, %v1060_v50 }
 0x2e9   : > { %1940 = vmatmul.mubr.msk.bf16.vlgmr.msra.gmra.mrb[0].mxu0 %vm731_vm0, %v760_v45  ;;  %1948 = vmatmul.mubr.msk.bf16.vlgmr.msra.gmra.mrb[0].mxu1 %vm731_vm0, %v760_v45  ;;  %v776_v51 = vadd.f32 %v1904_v38, %v775_v47 }
 0x2ea   : > { %1952 = vmatpush3.bf16.msra.mxu0 %v2210_v43  ;;  %1960 = vmatpush3.bf16.msra.mxu1 %v2211_v44  ;;  %v1074_v58 = vadd.f32 %v1904_v38, %v1067_v55 }
 0x2eb   : > { %1953 = vmatprep.subr.bf16.mxu0 %v2761_v23  ;;  %1961 = vmatprep.subr.bf16.mxu1 %v2761_v23  ;;  %v777_v54 = vpack.c.bf16 %v776_v51, %v776_v51 }
 0x2ec   : > { %1955 = vmatprep.mubr.msk.bf16.mxu0 %vm2762_vm1, %v2761_v23  ;;  %1963 = vmatprep.mubr.msk.bf16.mxu1 %vm2762_vm1, %v2761_v23  ;;  %v1075_v59 = vpack.c.bf16 %v1074_v58, %v1074_v58 }
 0x2ee   : > { %1954 = vmatpush3.bf16.msra.mxu0 %v2212_v48  ;;  %1962 = vmatpush3.bf16.msra.mxu1 %v2213_v49 }
 0x2ef   : > { %1967 = vmatprep.subr.bf16.mxu0 %v2761_v23  ;;  %1975 = vmatprep.subr.bf16.mxu1 %v2761_v23 }
 0x2f1   : > { %1956 = vmatmul.mubr.msk.bf16.vlgmr.msra.gmra.mrb[4].mxu0 %vm731_vm0, %v777_v54  ;;  %1964 = vmatmul.mubr.msk.bf16.vlgmr.msra.gmra.mrb[4].mxu1 %vm731_vm0, %v777_v54 }
 0x2f2   : > { %1968 = vmatpush3.bf16.msra.mxu0 %v2214_v52  ;;  %1976 = vmatpush3.bf16.msra.mxu1 %v2215_v53 }
 0x2f3   : > { %1969 = vmatprep.subr.bf16.mxu0 %v2761_v23  ;;  %1977 = vmatprep.subr.bf16.mxu1 %v2761_v23 }
 0x2f4   : > { %1971 = vmatprep.mubr.msk.bf16.mxu0 %vm2762_vm1, %v2761_v23  ;;  %1979 = vmatprep.mubr.msk.bf16.mxu1 %vm2762_vm1, %v2761_v23 }
 0x2f6   : > { %1970 = vmatpush3.bf16.msra.mxu0 %v2216_v56  ;;  %1978 = vmatpush3.bf16.msra.mxu1 %v2217_v57 }
 0x2f7   : > { %1983 = vmatprep.subr.bf16.mxu0 %v2761_v23  ;;  %1989 = vmatprep.subr.bf16.mxu1 %v2761_v23 }
 0x2f9   : > { %1972 = vmatmul.mubr.msk.bf16.vlgmr.msra.gmra.mrb[8].mxu0 %vm731_vm0, %v1075_v59  ;;  %1980 = vmatmul.mubr.msk.bf16.vlgmr.msra.gmra.mrb[8].mxu1 %vm731_vm0, %v1075_v59 }
 0x2fa   : > { %1985 = vmatprep.mubr.msk.bf16.mxu0 %vm2762_vm1, %v2761_v23  ;;  %1991 = vmatprep.mubr.msk.bf16.mxu1 %vm2762_vm1, %v2761_v23 }
 0x3bc   : > { %v849_v62 = vpop.f32.mrb[0].mxu0  ;;  %v901_v63 = vpop.f32.mrb[0].mxu1 }
 0x3bd   : > { %v850_v0 = vadd.f32 %v1864_v60, %v849_v62  ;;  %v902_v2 = vadd.f32 %v1865_v61, %v901_v63  ;;  %v1941_v3 = vpop.f32.mrb[1].mxu0  ;;  %v1949_v4 = vpop.f32.mrb[1].mxu1 }
 0x3be   : > { %v852_v5 = vpop.f32.mrb[2].mxu0  ;;  %v904_v6 = vpop.f32.mrb[2].mxu1 }
 0x3bf   : > { %v1036_v7 = vpack.c.bf16 %v850_v0, %v850_v0  ;;  %v1037_v8 = vpack.c.bf16 %v902_v2, %v902_v2  ;;  %v1942_v9 = vpop.f32.mrb[3].mxu0  ;;  %v1950_v10 = vpop.f32.mrb[3].mxu1 }
 0x3c1   : > { %1039 = vst.msk [vmem:[#allocation2] sm:$0xf] %vm1038_vm2, %v1036_v7  ;;  %1040 = vst.msk [vmem:[#allocation2 + $0x4] sm:$0xf] %vm1038_vm2, %v1037_v8 }
 0x3c4   : > { %v978_v13 = vpop.f32.mrb[4].mxu0  ;;  %v1030_v14 = vpop.f32.mrb[4].mxu1 }
 0x3c5   : > { %v979_v15 = vadd.f32 %v1872_v11, %v978_v13  ;;  %v1031_v16 = vadd.f32 %v1873_v12, %v1030_v14  ;;  %v1957_v17 = vpop.f32.mrb[5].mxu0  ;;  %v1965_v18 = vpop.f32.mrb[5].mxu1  ;;  %v2219_v11 = vld [vmem:[#allocation22 + $0x8] sm:$0xff]   ;;  %v2218_v13 = vld [vmem:[#allocation22] sm:$0xff]  }
 0x3c6   : > { %v981_v19 = vpop.f32.mrb[6].mxu0  ;;  %v1033_v20 = vpop.f32.mrb[6].mxu1 }
 0x3c7   : > { %v1041_v21 = vpack.c.bf16 %v979_v15, %v979_v15  ;;  %v1042_v22 = vpack.c.bf16 %v1031_v16, %v1031_v16  ;;  %v1958_v24 = vpop.f32.mrb[7].mxu0  ;;  %v1966_v25 = vpop.f32.mrb[7].mxu1 }
 0x3c8   : > { %v1207_v26 = vld [vmem:[#allocation2] sm:$0xf]  ;;  %v1208_v27 = vld [vmem:[#allocation2 + $0x4] sm:$0xf] }
 0x3c9   : > { %1043 = vst.msk [vmem:[#allocation3] sm:$0xf] %vm1038_vm2, %v1041_v21  ;;  %1044 = vst.msk [vmem:[#allocation3 + $0x4] sm:$0xf] %vm1038_vm2, %v1042_v22  ;;  %v1214_v28 = vsel %vm1209_vm3, %v1207_v26, 0  ;;  %v1260_v29 = vsel %vm1209_vm3, %v1208_v27, 0 }
 0x3ca   : > { %1984 = vmatpush3.bf16.xpose.msra.mxu0 %v1214_v28  ;;  %1990 = vmatpush3.bf16.xpose.msra.mxu1 %v1260_v29 }
 0x3cb   : > { %1995 = vmatprep.subr.bf16.mxu0 %v2761_v23  ;;  %2001 = vmatprep.subr.bf16.mxu1 %v2761_v23 }
 0x3cc   : > { %v1147_v32 = vpop.f32.mrb[8].mxu0  ;;  %v1199_v33 = vpop.f32.mrb[8].mxu1 }
 0x3cd   : > { %v1148_v34 = vadd.f32 %v1880_v30, %v1147_v32  ;;  %v1200_v35 = vadd.f32 %v1881_v31, %v1199_v33  ;;  %v1973_v36 = vpop.f32.mrb[9].mxu0  ;;  %v1981_v37 = vpop.f32.mrb[9].mxu1 }
 0x3ce   : > { %v1150_v38 = vpop.f32.mrb[10].mxu0  ;;  %v1202_v39 = vpop.f32.mrb[10].mxu1 }
 0x3cf   : > { %v1205_v40 = vpack.c.bf16 %v1148_v34, %v1148_v34  ;;  %v1206_v41 = vpack.c.bf16 %v1200_v35, %v1200_v35  ;;  %v1974_v42 = vpop.f32.mrb[11].mxu0  ;;  %v1982_v43 = vpop.f32.mrb[11].mxu1 }
 0x3d0   : > { %v1329_v44 = vld [vmem:[#allocation3] sm:$0xf]  ;;  %v1330_v45 = vld [vmem:[#allocation3 + $0x4] sm:$0xf] }
 0x3d1   : > { %1986 = vmatmul.mubr.msk.bf16.vlgmr.msra.gmra.mrb[12].mxu0 %vm1209_vm3, %v1205_v40  ;;  %1992 = vmatmul.mubr.msk.bf16.vlgmr.msra.gmra.mrb[12].mxu1 %vm1209_vm3, %v1206_v41  ;;  %v1336_v46 = vsel %vm1334_vm4, %v1329_v44, 0  ;;  %v1382_v47 = vsel %vm1334_vm4, %v1330_v45, 0 }
 0x3d2   : > { %1996 = vmatpush3.bf16.msra.mxu0 %v1336_v46  ;;  %2002 = vmatpush3.bf16.msra.mxu1 %v1382_v47 }
 0x3d3   : > { %1997 = vmatprep.mubr.msk.bf16.mxu0 %vm2762_vm1, %v2761_v23  ;;  %2003 = vmatprep.mubr.msk.bf16.mxu1 %vm2762_vm1, %v2761_v23 }
 0x3d4   : > { %2007 = vmatprep.subr.bf16.mxu0 %v2761_v23  ;;  %2013 = vmatprep.subr.bf16.mxu1 %v2761_v23 }
 0x4a4   : > { %v1250_v48 = vpop.f32.mrb[12].mxu0  ;;  %v1296_v49 = vpop.f32.mrb[12].mxu1 }
 0x4a5   : > { %v1987_v50 = vpop.f32.mrb[13].mxu0  ;;  %v1993_v51 = vpop.f32.mrb[13].mxu1  ;;  %v1306_v52 = vsel %vm1302_vm5, %v1296_v49, -inf  ;;  %v1303_v53 = vsel %vm1302_vm5, %v1250_v48, -inf }
 0x4a6   : > { %1307 = vmax.xlane.f32.xlu1 %v1306_v52  ;;  %v1299_v54 = vpop.f32.mrb[14].mxu1  ;;  %1304 = vmax.xlane.f32.xlu0 %v1303_v53  ;;  %v1253_v55 = vpop.f32.mrb[14].mxu0 }
 0x4a7   : > { %v1988_v56 = vpop.f32.mrb[15].mxu0  ;;  %v1994_v57 = vpop.f32.mrb[15].mxu1 }
 0x533   : > { %v1308_v58 = vpop.xlane.xlu1 %1307  ;;  %v1305_v59 = vpop.xlane.xlu0 %1304 }
 0x534   : > { %v1310_v60 = vsub.f32 %v1296_v49, %v1308_v58  ;;  %v1309_v61 = vsub.f32 %v1250_v48, %v1305_v59 }
 0x536   : > { %v1313_v62 = vmul.f32 1.442695, %v1310_v60  ;;  %v1311_v63 = vmul.f32 1.442695, %v1309_v61 }
 0x538   : > { %2226 = vpow2.f32 %v1313_v62 }
 0x539   : > { %2228 = vpow2.f32 %v1311_v63 }
 0x542   : > { %v2227_v0 = vpop.eup %2226 }
 0x543   : > { %v2229_v2 = vpop.eup %2228  ;;  %v1318_v3 = vsel %vm1302_vm5, %v2227_v0, 0.0 }
 0x544   : > { %1319 = vadd.xlane.f32.xlu1 %v1318_v3  ;;  %v1315_v4 = vsel %vm1302_vm5, %v2229_v2, 0.0 }
 0x545   : > { %1316 = vadd.xlane.f32.xlu0 %v1315_v4 }
 0x5d1   : > { %v1320_v5 = vpop.xlane.xlu1 %1319 }
 0x5d2   : > { %2230 = vrcp.f32 %v1320_v5  ;;  %v1317_v6 = vpop.xlane.xlu0 %1316 }
 0x5d3   : > { %2232 = vrcp.f32 %v1317_v6 }
 0x5dc   : > { %v2231_v7 = vpop.eup %2230 }
 0x5dd   : > { %v2233_v8 = vpop.eup %2232  ;;  %v1324_v9 = vmul.f32 %v2231_v7, %v2227_v0 }
 0x5de   : > { %v1323_v10 = vmul.f32 %v2233_v8, %v2229_v2 }
 0x5df   : > { %1326 = vst.msk [vmem:[%s722_s16 + $0x8] sm:$0xff] %vm1302_vm5, %v1324_v9  ;;  %v1328_v12 = vpack.c.bf16 %v1324_v9, %v1324_v9 }
 0x5e0   : > { %1325 = vst.msk [vmem:[%s722_s16] sm:$0xff] %vm1302_vm5, %v1323_v10  ;;  %v1327_v14 = vpack.c.bf16 %v1323_v10, %v1323_v10 }
 0x5e1   : > { %2004 = vmatmul.mubr.msk.bf16.vlgmr.msra.gmra.mrb[16].mxu1 %vm1302_vm5, %v1328_v12 }
 0x5e2   : > { %1998 = vmatmul.mubr.msk.bf16.vlgmr.msra.gmra.mrb[16].mxu0 %vm1302_vm5, %v1327_v14  ;;  %2014 = vmatpush3.bf16.msra.mxu1 %v2219_v11 }
 0x5e3   : > { %2008 = vmatpush3.bf16.msra.mxu0 %v2218_v13  ;;  %2009 = vmatprep.mubr.msk.bf16.mxu0 %vm2762_vm1, %v2761_v23 }
 0x5e4   : > { %2015 = vmatprep.mubr.msk.bf16.mxu1 %vm2762_vm1, %v2761_v23 }
 0x6b4   : > { %v1418_v15 = vpop.f32.mrb[16].mxu1 }
 0x6b5   : > { %v1372_v16 = vpop.f32.mrb[16].mxu0  ;;  %v1425_v17 = vpack.c.bf16 %v1418_v15, %v1418_v15  ;;  %v2005_v18 = vpop.f32.mrb[17].mxu1 }
 0x6b6   : > { %v1424_v19 = vpack.c.bf16 %v1372_v16, %v1372_v16  ;;  %v1999_v20 = vpop.f32.mrb[17].mxu0  ;;  %v1421_v21 = vpop.f32.mrb[18].mxu1 }
 0x6b7   : > { %v1375_v22 = vpop.f32.mrb[18].mxu0  ;;  %v2006_v24 = vpop.f32.mrb[19].mxu1  ;;  %2016 = vmatmul.mubr.msk.bf16.vlgmr.msra.gmra.mrb[20].mxu1 %vm1209_vm3, %v1425_v17 }
 0x6b8   : > { %v2000_v25 = vpop.f32.mrb[19].mxu0  ;;  %2010 = vmatmul.mubr.msk.bf16.vlgmr.msra.gmra.mrb[20].mxu0 %vm1209_vm3, %v1424_v19 }
 0x6b9   : > { %2617 = shalt.err (!%p2614_p4)
}
 0x6ba   : > { %s2618_s13 = scalar_lea.hbm %s3389_s25, 256  ;;  %s2622_s2 = scalar_lea.hbm %s3578_s10, 512 }
 0x6bb   : > { %p2619_p7 = scmp.ne.s32.totalorder %s3389_s25, %s2618_s13  ;;  %p2623_p8 = scmp.lt.u32.totalorder %s3389_s25, %s3578_s10 }
 0x6bc   : > { %p2624_p2 = scmp.lt.u32.totalorder %s2622_s2, %s2618_s13  ;;  %p2626_p9 = scmp.lt.u32.totalorder %s2618_s13, %s3389_s25 }
 0x6bd   : > { %p2620_p6 = pnand %p2619_p7, %p3579_p10 }
 0x6be   : > { %p2625_p1 = por %p2624_p2, %p2623_p8 }
 0x6bf   : > { %p2621_p3 = pneg %p2620_p6 }
 0x6c0   : > { %p2627_p0 = por %p2626_p9, %p2625_p1 }
 0x6c2   : > { %p2628_p5 = pnand %p2627_p0, %p2621_p3 }
 0x6c4   : > { %2631 = shalt.err (!%p2628_p5)
}
 0x6c5   : > { %s2764_s16 = smov 128   ;;  %s2765_s14 = smov 256   ;;  %v1896_v30 = vld [vmem:[#allocation24] ss:$0 sm:$0xff] }
 0x6c6   : > { %s2766_s20 = smov 8   ;;  %s715_s23 = scalar_lea.vmem [#allocation25], %s3271_s26 }
 0x6c7   : > { %2066 = dma.vmem_to_hbm [thread:$0]  (%p3579_p10), %s3391_s22, 256, %s3389_s25, %s1547_s5, %s2764_s16, %s2765_s14, %s2766_s20  }
 0x6c8   : > { %s1561_s18 = sshll.u32 %s715_s23, 4  ;;  %s3580_s5 = sld [smem:[#allocation55_spill]]  ;;  %s3428_s18 = int_to_ptr.vmem [resolvable:$true] %s1561_s18 }
 0x6c9   : > { %s1542_s9 = scalar_lea.sflag [#allocation6], %s3268_s0  ;;  %s2632_s13 = scalar_lea.vmem %s3428_s18, 128 }
 0x6ca   : > { %p2633_p12 = scmp.ne.s32.totalorder %s3428_s18, %s2632_s13  ;;  %s2767_s26 = smov [#allocation25]  }
 0x6cb   : > { %s2636_s29 = sshll.u32 %s2767_s26, 4  ;;  %s2637_s29 = int_to_ptr.vmem [resolvable:$false] %s2636_s29 }
 0x6cc   : > { %p2634_p11 = pnand %p2633_p12, %p3579_p10  ;;  %s2638_s7 = scalar_lea.vmem %s2637_s29, 256 }
 0x6cd   : > { %p2639_p4 = scmp.lt.s32.totalorder %s3428_s18, %s2637_s29  ;;  %p2640_p7 = scmp.lt.s32.totalorder %s2638_s7, %s2632_s13 }
 0x6ce   : > { %s3426_s17 = scalar_lea.hbm %s3580_s5, %s1899_s1  ;;  %p2635_p13 = pneg %p2634_p11 }
 0x6cf   : > { %p2641_p6 = por %p2640_p7, %p2639_p4 }
 0x6d1   : > { %p2642_p3 = pnand %p2641_p6, %p2635_p13 }
 0x78a   : > { %v1522_v23 = vpop.f32.mrb[20].mxu1 }
 0x78b   : > { %v1473_v26 = vpop.f32.mrb[20].mxu0  ;;  %v1529_v27 = vsel %vm731_vm0, %v1522_v23, 0.0  ;;  %v2017_v28 = vpop.f32.mrb[21].mxu1 }
 0x78c   : > { %v1528_v29 = vsel %vm731_vm0, %v1473_v26, 0.0  ;;  %v2011_v31 = vpop.f32.mrb[21].mxu0  ;;  %v1525_v32 = vpop.f32.mrb[22].mxu1 }
 0x78d   : > { %v1530_v33 = vadd.f32 %v1529_v27, %v1528_v29  ;;  %v1476_v34 = vpop.f32.mrb[22].mxu0  ;;  %v2018_v35 = vpop.f32.mrb[23].mxu1 }
 0x78e   : > { %v2012_v36 = vpop.f32.mrb[23].mxu0 }
 0x78f   : > { %v1538_v37 = vadd.f32 %v1896_v30, %v1530_v33 }
 0x791   : > { %v1539_v38 = vadd.f32 %v1538_v37, %v3306_v1 }
 0x793   : > { %1540 = vst.msk [vmem:[%s715_s23] sm:$0xff] %vm731_vm0, %v1539_v38 }
 0x794   : > { %2645 = shalt.err (!%p2642_p3)
}
 0x795   : > { %s2646_s0 = scalar_lea.hbm %s3426_s17, 128  ;;  %s2650_s2 = scalar_lea.hbm %s3580_s5, 256 }
 0x796   : > { %p2647_p8 = scmp.ne.s32.totalorder %s3426_s17, %s2646_s0  ;;  %p2651_p9 = scmp.lt.u32.totalorder %s3426_s17, %s3580_s5 }
 0x797   : > { %p2652_p0 = scmp.lt.u32.totalorder %s2650_s2, %s2646_s0  ;;  %p2654_p12 = scmp.lt.u32.totalorder %s2646_s0, %s3426_s17 }
 0x798   : > { %p2648_p2 = pnand %p2647_p8, %p3579_p10 }
 0x799   : > { %p2653_p5 = por %p2652_p0, %p2651_p9 }
 0x79a   : > { %p2649_p1 = pneg %p2648_p2 }
 0x79b   : > { %p2655_p11 = por %p2654_p12, %p2653_p5 }
 0x79d   : > { %p2656_p13 = pnand %p2655_p11, %p2649_p1 }
 0x79f   : > { %2659 = shalt.err (!%p2656_p13)
}
 0x7a0   : > { %2065 = dma.vmem_to_hbm [thread:$0]  (%p3579_p10), %s3428_s18, 128, %s3426_s17, %s1542_s9  }
 0x7a1 PF: > { %s3581_s16 = sld [smem:[#allocation37_spill]]  ;;  %s3582_s14 = sld [smem:[#allocation44_spill]] }
 0x7a2   : > { %s3583_s20 = sld [smem:[#allocation40_spill]] }
 0x7a7   : > { %s1589_s23 = sand.u32 1, %s3581_s16   ;;  %p3584_p4 = scmp.ne.s32.totalorder %s3582_s14, 0 }
 0x7a8   : > { %p3585_p7 = scmp.ge.s32.totalorder %s3583_s20, 2  ;;  %s1590_s25 = scalar_lea.sflag [#allocation6], %s1589_s23 }
 0x7aa   : > { %p2111_p6 = pnand %p3585_p7, %p3584_p4 }
 0x7ac   : > { %2713 = dma.done.wait (!%p2111_p6), %s1590_s25, 128  }
 0x7ad   : > { %2715 = vsyncadd (!%p2111_p6), %s1590_s25, 4294967168  ;;  %s1599_s22 = scalar_lea.sflag [#allocation27], %s1589_s23 }
 0x7ae   : > { %2717 = dma.done.wait (!%p2111_p6), %s1599_s22, 256  }
 0x7af   : > { %2719 = vsyncadd (!%p2111_p6), %s1599_s22, 4294967040  ;;  %s42_s18 = sadd.s32 1, %s3583_s20   ;;  %s3586_s28 = sld [smem:[#allocation43_spill]] }
 0x7b0   : > { %p39_p3 = scmp.ge.s32.totalorder %s42_s18, 4   ;;  %s3587_s16 = sld [smem:[#allocation39_spill]] }
 0x7b1   : > { %s3588_s17 = sld [smem:[#allocation42_spill]]  ;;  %s3589_s29 = smov %s2726_s30 }
 0x7b2   : > { %s3590_s30 = smov %s2730_s15  ;;  %41 = sbr.rel (!%p39_p3) target bundleno = 28 (0x1c), region = 202 }
 0x7b5   : > { %s3591_s15 = smov %s3586_s28 }
 0x7b9   :  { %1604 = vsyncpa [#allocation5], 1 }
 0x7ba   :  { %1606 = vsyncpa [#allocation5 + $0x1], 1 }
 0x7bb   :  { %1607 = vsyncpa [#allocation8], 1 }
 0x7bc   :  { %1609 = vsyncpa [#allocation8 + $0x1], 1 }
 0x7bd   :  { %1610 = vsyncpa [#allocation11], 1 }
 0x7be   :  { %1611 = vsyncpa [#allocation14], 1 }
 0x7bf   :  { %1612 = vsyncpa [#allocation17], 1 }
 0x7c0   :  { %1613 = vsyncpa [#allocation20], 1 }
 0x7c1   :  { %1614 = vsyncpa [#allocation23], 1 }
 0x7c2   :  { %1615 = vsyncpa [#allocation6], 1 }
 0x7c3   :  { %1617 = vsyncpa [#allocation6 + $0x1], 1 }
 0x7c4   :  { %1618 = vsyncpa [#allocation27], 1 }
 0x7c5   :  { %1620 = vsyncpa [#allocation27 + $0x1], 1 }

</bundles_post_ra>
